<compile_context>
chip_gen: v7x
topology: tpu7x:2x2x1
jax: 0.10.0
libtpu: 0.0.40
codegen_flags: <defaults>
</compile_context>

<pallas_src>
import functools

import jax
import jax.numpy as jnp
from jax.experimental import pallas as pl
from jax.experimental.pallas import tpu as pltpu


def _topk_partial_sums(s, ks, iota):
    """Running sums of the largest values along the sublane (first) axis.

    s: [J, Bt].  Iteratively extracts the max along axis 0, masking exactly one
    (the first) occurrence per step so duplicate values match torch.topk sum
    semantics.  Returns {k: sum of the top-k values, shape [1, Bt]} for k in ks.
    """
    n = s.shape[0]
    kmax = max(ks)
    neg_inf = jnp.float32(-jnp.inf)
    acc = jnp.zeros((1, s.shape[1]), dtype=s.dtype)
    out = {}
    for step in range(1, kmax + 1):
        m = jnp.max(s, axis=0, keepdims=True)                       # [1, Bt]
        is_max = s == m
        first = jnp.min(jnp.where(is_max, iota, n), axis=0, keepdims=True)
        s = jnp.where(iota == first, neg_inf, s)
        acc = acc + m
        if step in ks:
            out[step] = acc
    return out


def dpe_kernel(f_rad_ref, f_histo_ref, flag_ref, wt_ref, bt_ref, out_ref, *,
               topk_pos, topk_neg):
    f_rad = f_rad_ref[...]      # [I, Bt]  f32 (batch on lanes)
    f_histo = f_histo_ref[...]  # [J, Bt]  f32

    # F.normalize(x, p=2, dim=feature) == x * rsqrt(max(ss, eps^2)); the
    # feature axis is now the sublane axis, so this is a sublane reduce.
    eps2 = jnp.float32(1e-24)
    rn = f_rad * jax.lax.rsqrt(
        jnp.maximum(jnp.sum(f_rad * f_rad, axis=0, keepdims=True), eps2))
    hn = f_histo * jax.lax.rsqrt(
        jnp.maximum(jnp.sum(f_histo * f_histo, axis=0, keepdims=True), eps2))

    # Rank-1 exploit: sim[b,i,:] = rn[i,b] * hn[:,b], so top-k over j of
    # sim[b,i,:] is rn * top-k(hn) when rn >= 0 and rn * bottom-k(hn) otherwise.
    # Only top/bottom-k means of the [J, Bt] hn tile are needed.
    iota = jax.lax.broadcasted_iota(jnp.int32, hn.shape, 0)
    ks = {topk_pos, topk_neg}
    top_sums = _topk_partial_sums(hn, ks, iota)     # sums of largest-k of hn
    bot_sums = _topk_partial_sums(-hn, ks, iota)    # sums of largest-k of -hn

    t_hi_p = top_sums[topk_pos] * (1.0 / topk_pos)     # mean top-k_pos(hn)    [1,Bt]
    t_lo_p = bot_sums[topk_pos] * (-1.0 / topk_pos)    # mean bottom-k_pos(hn) [1,Bt]
    t_hi_n = top_sums[topk_neg] * (1.0 / topk_neg)
    t_lo_n = bot_sums[topk_neg] * (-1.0 / topk_neg)

    nonneg = rn >= 0.0
    pos_map = rn * jnp.where(nonneg, t_hi_p, t_lo_p)      # [I, Bt]
    neg_map = -rn * jnp.where(nonneg, t_lo_n, t_hi_n)     # [I, Bt]

    # class_layers = cat([pos, neg], feature dim); mlp = Linear(2I -> O).
    # In the transposed layout the concat is a sublane concat at offset I
    # (multiple of 8) and the whole MLP is one MXU push: W^T[O,2I] @ [2I,Bt].
    cls = jnp.concatenate([pos_map, neg_map], axis=0)     # [2I, Bt]
    emb = jnp.dot(wt_ref[...], cls, preferred_element_type=jnp.float32)  # [O, Bt]

    # out = emb + bias + missing_modality_token * flag   (all lane-dense)
    bt = bt_ref[...]                                       # [O, 2] = [bias | token]
    out_ref[...] = emb + bt[:, 0:1] + bt[:, 1:2] * flag_ref[...]


def _round_up(x, m):
    return ((x + m - 1) // m) * m


def dynamic_positional_embedding(f_rad, f_histo, rad_mask, histo_mask,
                                 w, b, token, *, topk_pos, topk_neg):
    """w: [2*C_in, C_out] (transposed vs torch Linear), b: [C_out], token: [1, C_out]."""
    B, I = f_rad.shape
    J = f_histo.shape[1]
    O = w.shape[1]
    if topk_pos > J or topk_neg > J:
        raise ValueError(
            f"topk ({topk_pos}, {topk_neg}) must be <= f_histo feature dim {J}")

    # Batch-on-lanes layout (wrapper-side layout plumbing): every operand and
    # the output become lane-dense; flag is a [1, B] row, bias/token a tiny
    # [O, 2] slab.
    f_rad_t = jnp.transpose(f_rad)        # [I, B]
    f_histo_t = jnp.transpose(f_histo)    # [J, B]
    flag = jnp.logical_not(
        jnp.logical_and(rad_mask.astype(bool), histo_mask.astype(bool))
    ).astype(jnp.float32).reshape(1, B)   # [1, B]
    wt = jnp.transpose(w)                 # [O, 2I]
    bt = jnp.stack([b.reshape(O), token.reshape(O)], axis=1)  # [O, 2]

    # Batch-tile policy:
    #   * small B: one full-array block (block dims == array dims, demo B=2).
    #   * large B: lane-aligned tiles (multiple of 128), >= 2 grid steps so
    #     both v7x TensorCores get work, capped at 8192 lanes so double-
    #     buffered operands + intermediates stay well under every generation's
    #     scoped VMEM (~2.6 MB/buffer-set at tb=8192 in this layout).
    if B <= 512:
        tb = B
        b_pad = B
    else:
        tb = min(8192, _round_up(pl.cdiv(B, 2), 128))
        b_pad = _round_up(B, tb)

    if b_pad != B:
        pad = ((0, 0), (0, b_pad - B))
        f_rad_t = jnp.pad(f_rad_t, pad)     # zero cols -> zero output, sliced off
        f_histo_t = jnp.pad(f_histo_t, pad)
        flag = jnp.pad(flag, pad)

    grid = (b_pad // tb,)
    kernel = functools.partial(dpe_kernel, topk_pos=topk_pos, topk_neg=topk_neg)
    out_t = pl.pallas_call(
        kernel,
        out_shape=jax.ShapeDtypeStruct((O, b_pad), jnp.float32),
        grid_spec=pltpu.PrefetchScalarGridSpec(
            num_scalar_prefetch=0,
            grid=grid,
            in_specs=[
                pl.BlockSpec((I, tb), lambda i: (0, i)),       # f_rad^T
                pl.BlockSpec((J, tb), lambda i: (0, i)),       # f_histo^T
                pl.BlockSpec((1, tb), lambda i: (0, i)),       # flag row
                pl.BlockSpec((O, 2 * I), lambda i: (0, 0)),    # W^T
                pl.BlockSpec((O, 2), lambda i: (0, 0)),        # [bias | token]
            ],
            out_specs=pl.BlockSpec((O, tb), lambda i: (0, i)),
        ),
        compiler_params=pltpu.CompilerParams(
            dimension_semantics=("parallel",),
            vmem_limit_bytes=32 * 1024 * 1024),
    )(f_rad_t, f_histo_t, flag, wt, bt)

    return jnp.transpose(out_t[:, :B])      # [B, O]


def reference(f_rad, f_histo, rad_mask, histo_mask, w, b, token, kp, kn):
    """Pure-JAX reference mirroring the PyTorch forward (full sim tensor)."""
    eps = 1e-12
    rn = f_rad / jnp.maximum(jnp.linalg.norm(f_rad, axis=1, keepdims=True), eps)
    hn = f_histo / jnp.maximum(jnp.linalg.norm(f_histo, axis=1, keepdims=True), eps)
    sim = jnp.einsum('bi,bj->bij', rn, hn)
    pos = jnp.mean(jax.lax.top_k(sim, kp)[0], axis=-1)
    neg = jnp.mean(jax.lax.top_k(-sim, kn)[0], axis=-1)
    feat = jnp.concatenate([pos, neg], axis=1)
    emb = feat @ w + b[None, :]
    flag = jnp.logical_not(rad_mask & histo_mask).astype(jnp.float32)[:, None]
    return emb + token * flag


if __name__ == "__main__":
    B = 2
    C_IN = 16          # f_rad feature dim  -> mlp input = 2 * C_IN
    C_HISTO = 32       # f_histo feature dim
    C_OUT = 32
    TOPK_POS = 8
    TOPK_NEG = 6       # different from TOPK_POS to exercise both k paths

    key = jax.random.PRNGKey(0)
    k1, k2, k3, k4, k5 = jax.random.split(key, 5)

    f_rad = jax.random.normal(k1, (B, C_IN), dtype=jnp.float32)
    f_histo = jax.random.normal(k2, (B, C_HISTO), dtype=jnp.float32)
    rad_mask = jnp.array([True, True])
    histo_mask = jnp.array([True, False])   # sample 1 has a missing modality

    # Deterministic synthetic parameters (Linear(2*C_IN, C_OUT) + token).
    fan_in = 2 * C_IN
    bound = 1.0 / (fan_in ** 0.5)
    w = jax.random.uniform(k3, (fan_in, C_OUT), jnp.float32, -bound, bound)
    b = jax.random.uniform(k4, (C_OUT,), jnp.float32, -bound, bound)
    # Module init is zeros; use small random values so the missing-modality
    # broadcast path is actually exercised numerically.
    token = 0.02 * jax.random.normal(k5, (1, C_OUT), dtype=jnp.float32)

    out = dynamic_positional_embedding(
        f_rad, f_histo, rad_mask, histo_mask, w, b, token,
        topk_pos=TOPK_POS, topk_neg=TOPK_NEG)
    out = jax.block_until_ready(out)

    ref = reference(f_rad, f_histo, rad_mask, histo_mask, w, b, token,
                    TOPK_POS, TOPK_NEG)

    assert out.shape == (B, C_OUT), out.shape
    assert jnp.allclose(out, ref, atol=1e-4, rtol=1e-4), (
        f"max abs diff {jnp.max(jnp.abs(out - ref))}")
    print("KERNEL_OK")
</pallas_src>

<mosaic_0001>
module attributes {stable_mosaic.version = 11 : i64} {
  func.func @dpe_kernel(%arg0: i32, %arg1: memref<16x2xf32, #tpu.memory_space<vmem>>, %arg2: memref<32x2xf32, #tpu.memory_space<vmem>>, %arg3: memref<1x2xf32, #tpu.memory_space<vmem>>, %arg4: memref<32x32xf32, #tpu.memory_space<vmem>>, %arg5: memref<32x2xf32, #tpu.memory_space<vmem>>, %arg6: memref<32x2xf32, #tpu.memory_space<vmem>>) attributes {dimension_semantics = [#tpu.dimension_semantics<parallel>], iteration_bounds = array<i64: 1>, scalar_prefetch = 0 : i64, scratch_operands = 0 : i64, tpu.core_type = #tpu.core_type<tc>, window_params = [{transform_indices = @transform_0, window_bounds = array<i64: 16, 2>}, {transform_indices = @transform_1, window_bounds = array<i64: 32, 2>}, {transform_indices = @transform_2, window_bounds = array<i64: 1, 2>}, {pipeline_mode = #tpu.pipeline_mode<synchronous>, transform_indices = @transform_3, window_bounds = array<i64: 32, 32>}, {pipeline_mode = #tpu.pipeline_mode<synchronous>, transform_indices = @transform_4, window_bounds = array<i64: 32, 2>}, {transform_indices = @transform_5, window_bounds = array<i64: 32, 2>}]} {
    %c0 = arith.constant 0 : index
    %c0_0 = arith.constant 0 : index
    %0 = vector.load %arg1[%c0, %c0_0] : memref<16x2xf32, #tpu.memory_space<vmem>>, vector<16x2xf32>
    %c0_1 = arith.constant 0 : index
    %c0_2 = arith.constant 0 : index
    %1 = vector.load %arg2[%c0_1, %c0_2] : memref<32x2xf32, #tpu.memory_space<vmem>>, vector<32x2xf32>
    %2 = arith.mulf %0, %0 : vector<16x2xf32>
    %cst = arith.constant dense<0.000000e+00> : vector<2xf32>
    %3 = vector.multi_reduction <add>, %2, %cst [0] : vector<16x2xf32> to vector<2xf32>
    %4 = vector.shape_cast %3 : vector<2xf32> to vector<1x2xf32>
    %cst_3 = arith.constant 1.000000e-24 : f32
    %5 = vector.broadcast %cst_3 : f32 to vector<1x2xf32>
    %6 = arith.maximumf %4, %5 : vector<1x2xf32>
    %7 = math.rsqrt %6 : vector<1x2xf32>
    %8 = vector.broadcast %7 : vector<1x2xf32> to vector<16x2xf32>
    %9 = arith.mulf %0, %8 : vector<16x2xf32>
    %10 = arith.mulf %1, %1 : vector<32x2xf32>
    %cst_4 = arith.constant dense<0.000000e+00> : vector<2xf32>
    %11 = vector.multi_reduction <add>, %10, %cst_4 [0] : vector<32x2xf32> to vector<2xf32>
    %12 = vector.shape_cast %11 : vector<2xf32> to vector<1x2xf32>
    %cst_5 = arith.constant 1.000000e-24 : f32
    %13 = vector.broadcast %cst_5 : f32 to vector<1x2xf32>
    %14 = arith.maximumf %12, %13 : vector<1x2xf32>
    %15 = math.rsqrt %14 : vector<1x2xf32>
    %16 = vector.broadcast %15 : vector<1x2xf32> to vector<32x2xf32>
    %17 = arith.mulf %1, %16 : vector<32x2xf32>
    %18 = tpu.iota {dimensions = array<i32: 0>} : vector<32x2xi32>
    %cst_6 = arith.constant 0.000000e+00 : f32
    %19 = vector.broadcast %cst_6 : f32 to vector<1x2xf32>
    %cst_7 = arith.constant dense<0xFF800000> : vector<2xf32>
    %20 = vector.multi_reduction <maximumf>, %17, %cst_7 [0] : vector<32x2xf32> to vector<2xf32>
    %21 = vector.shape_cast %20 : vector<2xf32> to vector<1x2xf32>
    %22 = vector.broadcast %21 : vector<1x2xf32> to vector<32x2xf32>
    %23 = arith.cmpf oeq, %17, %22 : vector<32x2xf32>
    %c32_i32 = arith.constant 32 : i32
    %24 = vector.broadcast %c32_i32 : i32 to vector<32x2xi32>
    %25 = arith.select %23, %18, %24 : vector<32x2xi1>, vector<32x2xi32>
    %cst_8 = arith.constant dense<2147483647> : vector<2xi32>
    %26 = vector.multi_reduction <minsi>, %25, %cst_8 [0] : vector<32x2xi32> to vector<2xi32>
    %27 = vector.shape_cast %26 : vector<2xi32> to vector<1x2xi32>
    %28 = vector.broadcast %27 : vector<1x2xi32> to vector<32x2xi32>
    %29 = arith.cmpi eq, %18, %28 : vector<32x2xi32>
    %cst_9 = arith.constant 0xFF800000 : f32
    %30 = vector.broadcast %cst_9 : f32 to vector<32x2xf32>
    %31 = arith.select %29, %30, %17 : vector<32x2xi1>, vector<32x2xf32>
    %32 = arith.addf %19, %21 : vector<1x2xf32>
    %cst_10 = arith.constant dense<0xFF800000> : vector<2xf32>
    %33 = vector.multi_reduction <maximumf>, %31, %cst_10 [0] : vector<32x2xf32> to vector<2xf32>
    %34 = vector.shape_cast %33 : vector<2xf32> to vector<1x2xf32>
    %35 = vector.broadcast %34 : vector<1x2xf32> to vector<32x2xf32>
    %36 = arith.cmpf oeq, %31, %35 : vector<32x2xf32>
    %c32_i32_11 = arith.constant 32 : i32
    %37 = vector.broadcast %c32_i32_11 : i32 to vector<32x2xi32>
    %38 = arith.select %36, %18, %37 : vector<32x2xi1>, vector<32x2xi32>
    %cst_12 = arith.constant dense<2147483647> : vector<2xi32>
    %39 = vector.multi_reduction <minsi>, %38, %cst_12 [0] : vector<32x2xi32> to vector<2xi32>
    %40 = vector.shape_cast %39 : vector<2xi32> to vector<1x2xi32>
    %41 = vector.broadcast %40 : vector<1x2xi32> to vector<32x2xi32>
    %42 = arith.cmpi eq, %18, %41 : vector<32x2xi32>
    %cst_13 = arith.constant 0xFF800000 : f32
    %43 = vector.broadcast %cst_13 : f32 to vector<32x2xf32>
    %44 = arith.select %42, %43, %31 : vector<32x2xi1>, vector<32x2xf32>
    %45 = arith.addf %32, %34 : vector<1x2xf32>
    %cst_14 = arith.constant dense<0xFF800000> : vector<2xf32>
    %46 = vector.multi_reduction <maximumf>, %44, %cst_14 [0] : vector<32x2xf32> to vector<2xf32>
    %47 = vector.shape_cast %46 : vector<2xf32> to vector<1x2xf32>
    %48 = vector.broadcast %47 : vector<1x2xf32> to vector<32x2xf32>
    %49 = arith.cmpf oeq, %44, %48 : vector<32x2xf32>
    %c32_i32_15 = arith.constant 32 : i32
    %50 = vector.broadcast %c32_i32_15 : i32 to vector<32x2xi32>
    %51 = arith.select %49, %18, %50 : vector<32x2xi1>, vector<32x2xi32>
    %cst_16 = arith.constant dense<2147483647> : vector<2xi32>
    %52 = vector.multi_reduction <minsi>, %51, %cst_16 [0] : vector<32x2xi32> to vector<2xi32>
    %53 = vector.shape_cast %52 : vector<2xi32> to vector<1x2xi32>
    %54 = vector.broadcast %53 : vector<1x2xi32> to vector<32x2xi32>
    %55 = arith.cmpi eq, %18, %54 : vector<32x2xi32>
    %cst_17 = arith.constant 0xFF800000 : f32
    %56 = vector.broadcast %cst_17 : f32 to vector<32x2xf32>
    %57 = arith.select %55, %56, %44 : vector<32x2xi1>, vector<32x2xf32>
    %58 = arith.addf %45, %47 : vector<1x2xf32>
    %cst_18 = arith.constant dense<0xFF800000> : vector<2xf32>
    %59 = vector.multi_reduction <maximumf>, %57, %cst_18 [0] : vector<32x2xf32> to vector<2xf32>
    %60 = vector.shape_cast %59 : vector<2xf32> to vector<1x2xf32>
    %61 = vector.broadcast %60 : vector<1x2xf32> to vector<32x2xf32>
    %62 = arith.cmpf oeq, %57, %61 : vector<32x2xf32>
    %c32_i32_19 = arith.constant 32 : i32
    %63 = vector.broadcast %c32_i32_19 : i32 to vector<32x2xi32>
    %64 = arith.select %62, %18, %63 : vector<32x2xi1>, vector<32x2xi32>
    %cst_20 = arith.constant dense<2147483647> : vector<2xi32>
    %65 = vector.multi_reduction <minsi>, %64, %cst_20 [0] : vector<32x2xi32> to vector<2xi32>
    %66 = vector.shape_cast %65 : vector<2xi32> to vector<1x2xi32>
    %67 = vector.broadcast %66 : vector<1x2xi32> to vector<32x2xi32>
    %68 = arith.cmpi eq, %18, %67 : vector<32x2xi32>
    %cst_21 = arith.constant 0xFF800000 : f32
    %69 = vector.broadcast %cst_21 : f32 to vector<32x2xf32>
    %70 = arith.select %68, %69, %57 : vector<32x2xi1>, vector<32x2xf32>
    %71 = arith.addf %58, %60 : vector<1x2xf32>
    %cst_22 = arith.constant dense<0xFF800000> : vector<2xf32>
    %72 = vector.multi_reduction <maximumf>, %70, %cst_22 [0] : vector<32x2xf32> to vector<2xf32>
    %73 = vector.shape_cast %72 : vector<2xf32> to vector<1x2xf32>
    %74 = vector.broadcast %73 : vector<1x2xf32> to vector<32x2xf32>
    %75 = arith.cmpf oeq, %70, %74 : vector<32x2xf32>
    %c32_i32_23 = arith.constant 32 : i32
    %76 = vector.broadcast %c32_i32_23 : i32 to vector<32x2xi32>
    %77 = arith.select %75, %18, %76 : vector<32x2xi1>, vector<32x2xi32>
    %cst_24 = arith.constant dense<2147483647> : vector<2xi32>
    %78 = vector.multi_reduction <minsi>, %77, %cst_24 [0] : vector<32x2xi32> to vector<2xi32>
    %79 = vector.shape_cast %78 : vector<2xi32> to vector<1x2xi32>
    %80 = vector.broadcast %79 : vector<1x2xi32> to vector<32x2xi32>
    %81 = arith.cmpi eq, %18, %80 : vector<32x2xi32>
    %cst_25 = arith.constant 0xFF800000 : f32
    %82 = vector.broadcast %cst_25 : f32 to vector<32x2xf32>
    %83 = arith.select %81, %82, %70 : vector<32x2xi1>, vector<32x2xf32>
    %84 = arith.addf %71, %73 : vector<1x2xf32>
    %cst_26 = arith.constant dense<0xFF800000> : vector<2xf32>
    %85 = vector.multi_reduction <maximumf>, %83, %cst_26 [0] : vector<32x2xf32> to vector<2xf32>
    %86 = vector.shape_cast %85 : vector<2xf32> to vector<1x2xf32>
    %87 = vector.broadcast %86 : vector<1x2xf32> to vector<32x2xf32>
    %88 = arith.cmpf oeq, %83, %87 : vector<32x2xf32>
    %c32_i32_27 = arith.constant 32 : i32
    %89 = vector.broadcast %c32_i32_27 : i32 to vector<32x2xi32>
    %90 = arith.select %88, %18, %89 : vector<32x2xi1>, vector<32x2xi32>
    %cst_28 = arith.constant dense<2147483647> : vector<2xi32>
    %91 = vector.multi_reduction <minsi>, %90, %cst_28 [0] : vector<32x2xi32> to vector<2xi32>
    %92 = vector.shape_cast %91 : vector<2xi32> to vector<1x2xi32>
    %93 = vector.broadcast %92 : vector<1x2xi32> to vector<32x2xi32>
    %94 = arith.cmpi eq, %18, %93 : vector<32x2xi32>
    %cst_29 = arith.constant 0xFF800000 : f32
    %95 = vector.broadcast %cst_29 : f32 to vector<32x2xf32>
    %96 = arith.select %94, %95, %83 : vector<32x2xi1>, vector<32x2xf32>
    %97 = arith.addf %84, %86 : vector<1x2xf32>
    %cst_30 = arith.constant dense<0xFF800000> : vector<2xf32>
    %98 = vector.multi_reduction <maximumf>, %96, %cst_30 [0] : vector<32x2xf32> to vector<2xf32>
    %99 = vector.shape_cast %98 : vector<2xf32> to vector<1x2xf32>
    %100 = vector.broadcast %99 : vector<1x2xf32> to vector<32x2xf32>
    %101 = arith.cmpf oeq, %96, %100 : vector<32x2xf32>
    %c32_i32_31 = arith.constant 32 : i32
    %102 = vector.broadcast %c32_i32_31 : i32 to vector<32x2xi32>
    %103 = arith.select %101, %18, %102 : vector<32x2xi1>, vector<32x2xi32>
    %cst_32 = arith.constant dense<2147483647> : vector<2xi32>
    %104 = vector.multi_reduction <minsi>, %103, %cst_32 [0] : vector<32x2xi32> to vector<2xi32>
    %105 = vector.shape_cast %104 : vector<2xi32> to vector<1x2xi32>
    %106 = vector.broadcast %105 : vector<1x2xi32> to vector<32x2xi32>
    %107 = arith.cmpi eq, %18, %106 : vector<32x2xi32>
    %cst_33 = arith.constant 0xFF800000 : f32
    %108 = vector.broadcast %cst_33 : f32 to vector<32x2xf32>
    %109 = arith.select %107, %108, %96 : vector<32x2xi1>, vector<32x2xf32>
    %110 = arith.addf %97, %99 : vector<1x2xf32>
    %cst_34 = arith.constant dense<0xFF800000> : vector<2xf32>
    %111 = vector.multi_reduction <maximumf>, %109, %cst_34 [0] : vector<32x2xf32> to vector<2xf32>
    %112 = vector.shape_cast %111 : vector<2xf32> to vector<1x2xf32>
    %113 = arith.addf %110, %112 : vector<1x2xf32>
    %cst_35 = arith.constant 0.000000e+00 : f32
    %114 = vector.broadcast %cst_35 : f32 to vector<32x2xf32>
    %115 = arith.subf %114, %17 : vector<32x2xf32>
    %cst_36 = arith.constant 0.000000e+00 : f32
    %116 = vector.broadcast %cst_36 : f32 to vector<1x2xf32>
    %cst_37 = arith.constant dense<0xFF800000> : vector<2xf32>
    %117 = vector.multi_reduction <maximumf>, %115, %cst_37 [0] : vector<32x2xf32> to vector<2xf32>
    %118 = vector.shape_cast %117 : vector<2xf32> to vector<1x2xf32>
    %119 = vector.broadcast %118 : vector<1x2xf32> to vector<32x2xf32>
    %120 = arith.cmpf oeq, %115, %119 : vector<32x2xf32>
    %c32_i32_38 = arith.constant 32 : i32
    %121 = vector.broadcast %c32_i32_38 : i32 to vector<32x2xi32>
    %122 = arith.select %120, %18, %121 : vector<32x2xi1>, vector<32x2xi32>
    %cst_39 = arith.constant dense<2147483647> : vector<2xi32>
    %123 = vector.multi_reduction <minsi>, %122, %cst_39 [0] : vector<32x2xi32> to vector<2xi32>
    %124 = vector.shape_cast %123 : vector<2xi32> to vector<1x2xi32>
    %125 = vector.broadcast %124 : vector<1x2xi32> to vector<32x2xi32>
    %126 = arith.cmpi eq, %18, %125 : vector<32x2xi32>
    %cst_40 = arith.constant 0xFF800000 : f32
    %127 = vector.broadcast %cst_40 : f32 to vector<32x2xf32>
    %128 = arith.select %126, %127, %115 : vector<32x2xi1>, vector<32x2xf32>
    %129 = arith.addf %116, %118 : vector<1x2xf32>
    %cst_41 = arith.constant dense<0xFF800000> : vector<2xf32>
    %130 = vector.multi_reduction <maximumf>, %128, %cst_41 [0] : vector<32x2xf32> to vector<2xf32>
    %131 = vector.shape_cast %130 : vector<2xf32> to vector<1x2xf32>
    %132 = vector.broadcast %131 : vector<1x2xf32> to vector<32x2xf32>
    %133 = arith.cmpf oeq, %128, %132 : vector<32x2xf32>
    %c32_i32_42 = arith.constant 32 : i32
    %134 = vector.broadcast %c32_i32_42 : i32 to vector<32x2xi32>
    %135 = arith.select %133, %18, %134 : vector<32x2xi1>, vector<32x2xi32>
    %cst_43 = arith.constant dense<2147483647> : vector<2xi32>
    %136 = vector.multi_reduction <minsi>, %135, %cst_43 [0] : vector<32x2xi32> to vector<2xi32>
    %137 = vector.shape_cast %136 : vector<2xi32> to vector<1x2xi32>
    %138 = vector.broadcast %137 : vector<1x2xi32> to vector<32x2xi32>
    %139 = arith.cmpi eq, %18, %138 : vector<32x2xi32>
    %cst_44 = arith.constant 0xFF800000 : f32
    %140 = vector.broadcast %cst_44 : f32 to vector<32x2xf32>
    %141 = arith.select %139, %140, %128 : vector<32x2xi1>, vector<32x2xf32>
    %142 = arith.addf %129, %131 : vector<1x2xf32>
    %cst_45 = arith.constant dense<0xFF800000> : vector<2xf32>
    %143 = vector.multi_reduction <maximumf>, %141, %cst_45 [0] : vector<32x2xf32> to vector<2xf32>
    %144 = vector.shape_cast %143 : vector<2xf32> to vector<1x2xf32>
    %145 = vector.broadcast %144 : vector<1x2xf32> to vector<32x2xf32>
    %146 = arith.cmpf oeq, %141, %145 : vector<32x2xf32>
    %c32_i32_46 = arith.constant 32 : i32
    %147 = vector.broadcast %c32_i32_46 : i32 to vector<32x2xi32>
    %148 = arith.select %146, %18, %147 : vector<32x2xi1>, vector<32x2xi32>
    %cst_47 = arith.constant dense<2147483647> : vector<2xi32>
    %149 = vector.multi_reduction <minsi>, %148, %cst_47 [0] : vector<32x2xi32> to vector<2xi32>
    %150 = vector.shape_cast %149 : vector<2xi32> to vector<1x2xi32>
    %151 = vector.broadcast %150 : vector<1x2xi32> to vector<32x2xi32>
    %152 = arith.cmpi eq, %18, %151 : vector<32x2xi32>
    %cst_48 = arith.constant 0xFF800000 : f32
    %153 = vector.broadcast %cst_48 : f32 to vector<32x2xf32>
    %154 = arith.select %152, %153, %141 : vector<32x2xi1>, vector<32x2xf32>
    %155 = arith.addf %142, %144 : vector<1x2xf32>
    %cst_49 = arith.constant dense<0xFF800000> : vector<2xf32>
    %156 = vector.multi_reduction <maximumf>, %154, %cst_49 [0] : vector<32x2xf32> to vector<2xf32>
    %157 = vector.shape_cast %156 : vector<2xf32> to vector<1x2xf32>
    %158 = vector.broadcast %157 : vector<1x2xf32> to vector<32x2xf32>
    %159 = arith.cmpf oeq, %154, %158 : vector<32x2xf32>
    %c32_i32_50 = arith.constant 32 : i32
    %160 = vector.broadcast %c32_i32_50 : i32 to vector<32x2xi32>
    %161 = arith.select %159, %18, %160 : vector<32x2xi1>, vector<32x2xi32>
    %cst_51 = arith.constant dense<2147483647> : vector<2xi32>
    %162 = vector.multi_reduction <minsi>, %161, %cst_51 [0] : vector<32x2xi32> to vector<2xi32>
    %163 = vector.shape_cast %162 : vector<2xi32> to vector<1x2xi32>
    %164 = vector.broadcast %163 : vector<1x2xi32> to vector<32x2xi32>
    %165 = arith.cmpi eq, %18, %164 : vector<32x2xi32>
    %cst_52 = arith.constant 0xFF800000 : f32
    %166 = vector.broadcast %cst_52 : f32 to vector<32x2xf32>
    %167 = arith.select %165, %166, %154 : vector<32x2xi1>, vector<32x2xf32>
    %168 = arith.addf %155, %157 : vector<1x2xf32>
    %cst_53 = arith.constant dense<0xFF800000> : vector<2xf32>
    %169 = vector.multi_reduction <maximumf>, %167, %cst_53 [0] : vector<32x2xf32> to vector<2xf32>
    %170 = vector.shape_cast %169 : vector<2xf32> to vector<1x2xf32>
    %171 = vector.broadcast %170 : vector<1x2xf32> to vector<32x2xf32>
    %172 = arith.cmpf oeq, %167, %171 : vector<32x2xf32>
    %c32_i32_54 = arith.constant 32 : i32
    %173 = vector.broadcast %c32_i32_54 : i32 to vector<32x2xi32>
    %174 = arith.select %172, %18, %173 : vector<32x2xi1>, vector<32x2xi32>
    %cst_55 = arith.constant dense<2147483647> : vector<2xi32>
    %175 = vector.multi_reduction <minsi>, %174, %cst_55 [0] : vector<32x2xi32> to vector<2xi32>
    %176 = vector.shape_cast %175 : vector<2xi32> to vector<1x2xi32>
    %177 = vector.broadcast %176 : vector<1x2xi32> to vector<32x2xi32>
    %178 = arith.cmpi eq, %18, %177 : vector<32x2xi32>
    %cst_56 = arith.constant 0xFF800000 : f32
    %179 = vector.broadcast %cst_56 : f32 to vector<32x2xf32>
    %180 = arith.select %178, %179, %167 : vector<32x2xi1>, vector<32x2xf32>
    %181 = arith.addf %168, %170 : vector<1x2xf32>
    %cst_57 = arith.constant dense<0xFF800000> : vector<2xf32>
    %182 = vector.multi_reduction <maximumf>, %180, %cst_57 [0] : vector<32x2xf32> to vector<2xf32>
    %183 = vector.shape_cast %182 : vector<2xf32> to vector<1x2xf32>
    %184 = vector.broadcast %183 : vector<1x2xf32> to vector<32x2xf32>
    %185 = arith.cmpf oeq, %180, %184 : vector<32x2xf32>
    %c32_i32_58 = arith.constant 32 : i32
    %186 = vector.broadcast %c32_i32_58 : i32 to vector<32x2xi32>
    %187 = arith.select %185, %18, %186 : vector<32x2xi1>, vector<32x2xi32>
    %cst_59 = arith.constant dense<2147483647> : vector<2xi32>
    %188 = vector.multi_reduction <minsi>, %187, %cst_59 [0] : vector<32x2xi32> to vector<2xi32>
    %189 = vector.shape_cast %188 : vector<2xi32> to vector<1x2xi32>
    %190 = vector.broadcast %189 : vector<1x2xi32> to vector<32x2xi32>
    %191 = arith.cmpi eq, %18, %190 : vector<32x2xi32>
    %cst_60 = arith.constant 0xFF800000 : f32
    %192 = vector.broadcast %cst_60 : f32 to vector<32x2xf32>
    %193 = arith.select %191, %192, %180 : vector<32x2xi1>, vector<32x2xf32>
    %194 = arith.addf %181, %183 : vector<1x2xf32>
    %cst_61 = arith.constant dense<0xFF800000> : vector<2xf32>
    %195 = vector.multi_reduction <maximumf>, %193, %cst_61 [0] : vector<32x2xf32> to vector<2xf32>
    %196 = vector.shape_cast %195 : vector<2xf32> to vector<1x2xf32>
    %197 = vector.broadcast %196 : vector<1x2xf32> to vector<32x2xf32>
    %198 = arith.cmpf oeq, %193, %197 : vector<32x2xf32>
    %c32_i32_62 = arith.constant 32 : i32
    %199 = vector.broadcast %c32_i32_62 : i32 to vector<32x2xi32>
    %200 = arith.select %198, %18, %199 : vector<32x2xi1>, vector<32x2xi32>
    %cst_63 = arith.constant dense<2147483647> : vector<2xi32>
    %201 = vector.multi_reduction <minsi>, %200, %cst_63 [0] : vector<32x2xi32> to vector<2xi32>
    %202 = vector.shape_cast %201 : vector<2xi32> to vector<1x2xi32>
    %203 = vector.broadcast %202 : vector<1x2xi32> to vector<32x2xi32>
    %204 = arith.cmpi eq, %18, %203 : vector<32x2xi32>
    %cst_64 = arith.constant 0xFF800000 : f32
    %205 = vector.broadcast %cst_64 : f32 to vector<32x2xf32>
    %206 = arith.select %204, %205, %193 : vector<32x2xi1>, vector<32x2xf32>
    %207 = arith.addf %194, %196 : vector<1x2xf32>
    %cst_65 = arith.constant dense<0xFF800000> : vector<2xf32>
    %208 = vector.multi_reduction <maximumf>, %206, %cst_65 [0] : vector<32x2xf32> to vector<2xf32>
    %209 = vector.shape_cast %208 : vector<2xf32> to vector<1x2xf32>
    %210 = arith.addf %207, %209 : vector<1x2xf32>
    %cst_66 = arith.constant 1.250000e-01 : f32
    %211 = vector.broadcast %cst_66 : f32 to vector<1x2xf32>
    %212 = arith.mulf %113, %211 : vector<1x2xf32>
    %cst_67 = arith.constant -1.250000e-01 : f32
    %213 = vector.broadcast %cst_67 : f32 to vector<1x2xf32>
    %214 = arith.mulf %210, %213 : vector<1x2xf32>
    %cst_68 = arith.constant 0.166666672 : f32
    %215 = vector.broadcast %cst_68 : f32 to vector<1x2xf32>
    %216 = arith.mulf %97, %215 : vector<1x2xf32>
    %cst_69 = arith.constant -0.166666672 : f32
    %217 = vector.broadcast %cst_69 : f32 to vector<1x2xf32>
    %218 = arith.mulf %194, %217 : vector<1x2xf32>
    %cst_70 = arith.constant 0.000000e+00 : f32
    %219 = vector.broadcast %cst_70 : f32 to vector<16x2xf32>
    %220 = arith.cmpf oge, %9, %219 : vector<16x2xf32>
    %221 = vector.shape_cast %212 : vector<1x2xf32> to vector<1x2xf32>
    %222 = vector.broadcast %221 : vector<1x2xf32> to vector<16x2xf32>
    %223 = vector.shape_cast %214 : vector<1x2xf32> to vector<1x2xf32>
    %224 = vector.broadcast %223 : vector<1x2xf32> to vector<16x2xf32>
    %225 = arith.select %220, %222, %224 : vector<16x2xi1>, vector<16x2xf32>
    %226 = arith.mulf %9, %225 : vector<16x2xf32>
    %cst_71 = arith.constant 0.000000e+00 : f32
    %227 = vector.broadcast %cst_71 : f32 to vector<16x2xf32>
    %228 = arith.subf %227, %9 : vector<16x2xf32>
    %229 = vector.shape_cast %218 : vector<1x2xf32> to vector<1x2xf32>
    %230 = vector.broadcast %229 : vector<1x2xf32> to vector<16x2xf32>
    %231 = vector.shape_cast %216 : vector<1x2xf32> to vector<1x2xf32>
    %232 = vector.broadcast %231 : vector<1x2xf32> to vector<16x2xf32>
    %233 = arith.select %220, %230, %232 : vector<16x2xi1>, vector<16x2xf32>
    %234 = arith.mulf %228, %233 : vector<16x2xf32>
    %235 = tpu.concatenate %226, %234 in 0 : vector<16x2xf32>, vector<16x2xf32> -> vector<32x2xf32>
    %c0_72 = arith.constant 0 : index
    %c0_73 = arith.constant 0 : index
    %236 = vector.load %arg4[%c0_72, %c0_73] : memref<32x32xf32, #tpu.memory_space<vmem>>, vector<32x32xf32>
    %cst_74 = arith.constant dense<0.000000e+00> : vector<32x2xf32>
    %237 = tpu.matmul %236, %235, %cst_74 {dimension_numbers = #tpu.dot_dimension_numbers<[1], [0], [0], [1], [0, 0, 1, 1], [], []>} : vector<32x32xf32>, vector<32x2xf32>, vector<32x2xf32> -> vector<32x2xf32>
    %c0_75 = arith.constant 0 : index
    %c0_76 = arith.constant 0 : index
    %238 = vector.load %arg5[%c0_75, %c0_76] : memref<32x2xf32, #tpu.memory_space<vmem>>, vector<32x2xf32>
    %239 = vector.extract_strided_slice %238 {offsets = [0, 0], sizes = [32, 1], strides = [1, 1]} : vector<32x2xf32> to vector<32x1xf32>
    %240 = vector.broadcast %239 : vector<32x1xf32> to vector<32x2xf32>
    %241 = arith.addf %237, %240 : vector<32x2xf32>
    %242 = vector.extract_strided_slice %238 {offsets = [0, 1], sizes = [32, 1], strides = [1, 1]} : vector<32x2xf32> to vector<32x1xf32>
    %c0_77 = arith.constant 0 : index
    %c0_78 = arith.constant 0 : index
    %243 = vector.load %arg3[%c0_77, %c0_78] : memref<1x2xf32, #tpu.memory_space<vmem>>, vector<1x2xf32>
    %244 = vector.broadcast %242 : vector<32x1xf32> to vector<32x2xf32>
    %245 = vector.broadcast %243 : vector<1x2xf32> to vector<32x2xf32>
    %246 = arith.mulf %244, %245 : vector<32x2xf32>
    %247 = arith.addf %241, %246 : vector<32x2xf32>
    %c0_79 = arith.constant 0 : index
    %c0_80 = arith.constant 0 : index
    %248 = vector.load %arg6[%c0_79, %c0_80] : memref<32x2xf32, #tpu.memory_space<vmem>>, vector<32x2xf32>
    tpu.vector_store %arg6[%c0_79, %c0_80], %247 {strides = array<i32>} : memref<32x2xf32, #tpu.memory_space<vmem>>, vector<32x2xf32>,
    return
  }
  func.func @transform_0(%arg0: i32) -> (i32, i32) {
    %c0_i32 = arith.constant 0 : i32
    %c0_i32_0 = arith.constant 0 : i32
    return %c0_i32, %arg0 : i32, i32
  }
  func.func @transform_1(%arg0: i32) -> (i32, i32) {
    %c0_i32 = arith.constant 0 : i32
    %c0_i32_0 = arith.constant 0 : i32
    return %c0_i32, %arg0 : i32, i32
  }
  func.func @transform_2(%arg0: i32) -> (i32, i32) {
    %c0_i32 = arith.constant 0 : i32
    %c0_i32_0 = arith.constant 0 : i32
    return %c0_i32, %arg0 : i32, i32
  }
  func.func @transform_3(%arg0: i32) -> (i32, i32) {
    %c0_i32 = arith.constant 0 : i32
    %c0_i32_0 = arith.constant 0 : i32
    %c0_i32_1 = arith.constant 0 : i32
    return %c0_i32, %c0_i32_0 : i32, i32
  }
  func.func @transform_4(%arg0: i32) -> (i32, i32) {
    %c0_i32 = arith.constant 0 : i32
    %c0_i32_0 = arith.constant 0 : i32
    %c0_i32_1 = arith.constant 0 : i32
    return %c0_i32, %c0_i32_0 : i32, i32
  }
  func.func @transform_5(%arg0: i32) -> (i32, i32) {
    %c0_i32 = arith.constant 0 : i32
    %c0_i32_0 = arith.constant 0 : i32
    return %c0_i32, %arg0 : i32, i32
  }
}

</mosaic_0001>

<bundles_post_ra>
// kernel: tpu_custom_call.1
= control target key start
LH: loop header
LB: loop body
LE: loop exit
PB: predicated region body
PF: predicated region fallthrough
CT: control target
= control target key end

     0   :  { %vm28_vm0 = vcmask 15360   ;;  %v65_v45 = vlaneseq  ;;  %s1750_s1 = inlined_call_operand.vmem [shape: f32[32,2], index: 1, kind: input, shape index: {}]   ;;  %s1751_s0 = inlined_call_operand.vmem [shape: f32[16,2], index: 0, kind: input, shape index: {}]   ;;  %s1752_s3 = inlined_call_operand.vmem [shape: f32[32,32], index: 3, kind: input, shape index: {}]   ;;  %s1753_s4 = inlined_call_operand.vmem [shape: f32[32,2], index: 4, kind: input, shape index: {}]   ;;  %s1754_s2 = inlined_call_operand.vmem [shape: f32[1,2], index: 2, kind: input, shape index: {}]   ;;  %s1755_s5 = inlined_call_operand.vmem [shape: f32[32,2], index: 5, kind: output, shape index: {}]  }
   0x1   :  { %v22_v0 = vld [vmem:[%s1750_s1] sm:$0xff]  ;;  %v23_v1 = vld [vmem:[%s1750_s1 + $0x8] sm:$0xff]  ;;  %v24_v2 = vld [vmem:[%s1750_s1 + $0x10] sm:$0xff] }
   0x2   :  { %v25_v3 = vld [vmem:[%s1750_s1 + $0x18] sm:$0xff]  ;;  %v42_v4 = vmul.f32 %v22_v0, %v22_v0  ;;  %v43_v5 = vmul.f32 %v23_v1, %v23_v1  ;;  %v44_v6 = vmul.f32 %v24_v2, %v24_v2  ;;  %v1102_v50 = vshrl.u32 %v65_v45, 7 }
   0x3   :  { %v45_v7 = vmul.f32 %v25_v3, %v25_v3 }
   0x4   :  { %v46_v8 = vsel %vm28_vm0, %v42_v4, 0.0  ;;  %v47_v9 = vsel %vm28_vm0, %v43_v5, 0.0  ;;  %v49_v10 = vsel %vm28_vm0, %v44_v6, 0.0  ;;  %v1105_v55 = vadd.s32 8, %v1102_v50 }
   0x5   :  { %v48_v11 = vadd.f32 %v47_v9, %v46_v8  ;;  %v51_v12 = vsel %vm28_vm0, %v45_v7, 0.0  ;;  %v1108_v56 = vadd.s32 16, %v1102_v50  ;;  %v1111_v57 = vadd.s32 24, %v1102_v50 }
   0x7   :  { %v50_v13 = vadd.f32 %v49_v10, %v48_v11 }
   0x9   :  { %v52_v14 = vadd.f32 %v51_v12, %v50_v13 }
   0xb   :  { %v53_v15 = vrot.slane %v52_v14, 4 }
   0xd   :  { %v54_v16 = vadd.f32 %v53_v15, %v52_v14 }
   0xf   :  { %v55_v17 = vrot.slane %v54_v16, 2 }
  0x11   :  { %v56_v18 = vadd.f32 %v55_v17, %v54_v16 }
  0x13   :  { %v57_v19 = vrot.slane %v56_v18, 1 }
  0x15   :  { %v58_v20 = vadd.f32 %v57_v19, %v56_v18 }
  0x17   :  { %v59_v21 = vmax.f32 %v58_v20, 1e-24 }
  0x19   :  { %1014 = vrsqrt.f32 %v59_v21 }
  0x23   :  { %v1015_v22 = vpop.eup %1014 }
  0x24   :  { %v1066_v23 = vmul.f32 %v1015_v22, %v22_v0  ;;  %v1068_v24 = vmul.f32 %v1015_v22, %v23_v1  ;;  %v1070_v25 = vmul.f32 %v1015_v22, %v24_v2  ;;  %v1072_v26 = vmul.f32 %v1015_v22, %v25_v3 }
  0x26   :  { %v70_v27 = vsel %vm28_vm0, %v1066_v23, -inf  ;;  %v71_v28 = vsel %vm28_vm0, %v1068_v24, -inf  ;;  %v72_v29 = vsel %vm28_vm0, %v1070_v25, -inf  ;;  %v73_v30 = vsel %vm28_vm0, %v1072_v26, -inf }
  0x27   :  { %v74_v31 = vmax.f32 %v70_v27, %v71_v28  ;;  %v75_v32 = vmax.f32 %v72_v29, %v73_v30  ;;  %v1083_v33 = vsub.f32 0.0, %v1066_v23  ;;  %v1086_v34 = vsub.f32 0.0, %v1068_v24 }
  0x28   :  { %v1089_v35 = vsub.f32 0.0, %v1070_v25  ;;  %v1092_v36 = vsub.f32 0.0, %v1072_v26 }
  0x29   :  { %v76_v37 = vmax.f32 %v74_v31, %v75_v32  ;;  %v431_v38 = vsel %vm28_vm0, %v1083_v33, -inf  ;;  %v432_v39 = vsel %vm28_vm0, %v1086_v34, -inf }
  0x2a   :  { %v433_v40 = vsel %vm28_vm0, %v1089_v35, -inf  ;;  %v434_v41 = vsel %vm28_vm0, %v1092_v36, -inf  ;;  %v435_v42 = vmax.f32 %v431_v38, %v432_v39 }
  0x2b   :  { %v77_v43 = vrot.slane %v76_v37, 4  ;;  %v436_v44 = vmax.f32 %v433_v40, %v434_v41 }
  0x2d   :  { %v78_v46 = vmax.f32 %v76_v37, %v77_v43  ;;  %v437_v47 = vmax.f32 %v435_v42, %v436_v44 }
  0x2f   :  { %v79_v48 = vrot.slane %v78_v46, 2  ;;  %v438_v49 = vrot.slane %v437_v47, 4 }
  0x31   :  { %v80_v51 = vmax.f32 %v78_v46, %v79_v48  ;;  %v439_v52 = vmax.f32 %v437_v47, %v438_v49 }
  0x33   :  { %v81_v53 = vrot.slane %v80_v51, 1  ;;  %v440_v54 = vrot.slane %v439_v52, 2 }
  0x35   :  { %v1113_v58 = vmax.f32 %v80_v51, %v81_v53  ;;  %v441_v59 = vmax.f32 %v439_v52, %v440_v54 }
  0x37   :  { %vm83_vm1 = vcmp.eq.f32.partialorder %v1066_v23, %v1113_v58  ;;  %vm84_vm2 = vcmp.eq.f32.partialorder %v1068_v24, %v1113_v58  ;;  %vm85_vm3 = vcmp.eq.f32.partialorder %v1070_v25, %v1113_v58  ;;  %vm86_vm4 = vcmp.eq.f32.partialorder %v1072_v26, %v1113_v58 }
  0x38   :  { %v87_v60 = vsel %vm83_vm1, %v1102_v50, 32  ;;  %v88_v61 = vsel %vm84_vm2, %v1105_v55, 32  ;;  %v89_v62 = vsel %vm85_vm3, %v1108_v56, 32  ;;  %v90_v63 = vsel %vm86_vm4, %v1111_v57, 32 }
  0x39   :  { %v91_v0 = vsel %vm28_vm0, %v87_v60, 2147483647  ;;  %v92_v1 = vsel %vm28_vm0, %v88_v61, 2147483647  ;;  %v93_v2 = vsel %vm28_vm0, %v89_v62, 2147483647 }
  0x3a   :  { %v94_v3 = vsel %vm28_vm0, %v90_v63, 2147483647  ;;  %vm95_vm5 = vcmp.lt.s32.totalorder %v91_v0, %v92_v1  ;;  %v442_v4 = vrot.slane %v441_v59, 1 }
  0x3b   :  { %v96_v5 = vsel %vm95_vm5, %v91_v0, %v92_v1  ;;  %vm97_vm6 = vcmp.lt.s32.totalorder %v93_v2, %v94_v3 }
  0x3c   :  { %v98_v6 = vsel %vm97_vm6, %v93_v2, %v94_v3  ;;  %v1131_v7 = vmax.f32 %v441_v59, %v442_v4 }
  0x3d   :  { %vm99_vm7 = vcmp.lt.s32.totalorder %v96_v5, %v98_v6 }
  0x3e   :  { %v100_v8 = vsel %vm99_vm7, %v96_v5, %v98_v6  ;;  %vm444_vm8 = vcmp.eq.f32.partialorder %v1083_v33, %v1131_v7  ;;  %vm445_vm9 = vcmp.eq.f32.partialorder %v1086_v34, %v1131_v7  ;;  %vm446_vm10 = vcmp.eq.f32.partialorder %v1089_v35, %v1131_v7 }
  0x3f   :  { %v101_v9 = vrot.slane %v100_v8, 4  ;;  %vm447_vm11 = vcmp.eq.f32.partialorder %v1092_v36, %v1131_v7  ;;  %v448_v10 = vsel %vm444_vm8, %v1102_v50, 32  ;;  %v449_v11 = vsel %vm445_vm9, %v1105_v55, 32 }
  0x40   :  { %v450_v12 = vsel %vm446_vm10, %v1108_v56, 32  ;;  %v451_v13 = vsel %vm447_vm11, %v1111_v57, 32  ;;  %v452_v14 = vsel %vm28_vm0, %v448_v10, 2147483647  ;;  %v453_v15 = vsel %vm28_vm0, %v449_v11, 2147483647 }
  0x41   :  { %vm102_vm12 = vcmp.lt.s32.totalorder %v100_v8, %v101_v9  ;;  %v454_v16 = vsel %vm28_vm0, %v450_v12, 2147483647  ;;  %v455_v17 = vsel %vm28_vm0, %v451_v13, 2147483647  ;;  %vm456_vm13 = vcmp.lt.s32.totalorder %v452_v14, %v453_v15 }
  0x42   :  { %v103_v18 = vsel %vm102_vm12, %v100_v8, %v101_v9  ;;  %v457_v19 = vsel %vm456_vm13, %v452_v14, %v453_v15  ;;  %vm458_vm14 = vcmp.lt.s32.totalorder %v454_v16, %v455_v17 }
  0x43   :  { %v104_v20 = vrot.slane %v103_v18, 2  ;;  %v459_v21 = vsel %vm458_vm14, %v454_v16, %v455_v17 }
  0x44   :  { %vm460_vm15 = vcmp.lt.s32.totalorder %v457_v19, %v459_v21 }
  0x45   :  { %vm105_vm1 = vcmp.lt.s32.totalorder %v103_v18, %v104_v20  ;;  %v461_v22 = vsel %vm460_vm15, %v457_v19, %v459_v21 }
  0x46   :  { %v106_v27 = vsel %vm105_vm1, %v103_v18, %v104_v20  ;;  %v462_v28 = vrot.slane %v461_v22, 4 }
  0x47   :  { %v107_v29 = vrot.slane %v106_v27, 1 }
  0x48   :  { %vm463_vm2 = vcmp.lt.s32.totalorder %v461_v22, %v462_v28 }
  0x49   :  { %vm108_vm3 = vcmp.lt.s32.totalorder %v106_v27, %v107_v29  ;;  %v464_v30 = vsel %vm463_vm2, %v461_v22, %v462_v28 }
  0x4a   :  { %v109_v31 = vsel %vm108_vm3, %v106_v27, %v107_v29  ;;  %v465_v32 = vrot.slane %v464_v30, 2 }
  0x4b   :  { %vm110_vm4 = vcmp.eq.s32.totalorder %v1102_v50, %v109_v31  ;;  %vm111_vm5 = vcmp.eq.s32.totalorder %v1105_v55, %v109_v31  ;;  %vm112_vm6 = vcmp.eq.s32.totalorder %v1108_v56, %v109_v31  ;;  %vm113_vm7 = vcmp.eq.s32.totalorder %v1111_v57, %v109_v31 }
  0x4c   :  { %v1154_v37 = vsel %vm110_vm4, -inf, %v1066_v23  ;;  %v1157_v38 = vsel %vm111_vm5, -inf, %v1068_v24  ;;  %v1160_v39 = vsel %vm112_vm6, -inf, %v1070_v25  ;;  %v1163_v40 = vsel %vm113_vm7, -inf, %v1072_v26 }
  0x4d   :  { %v119_v41 = vsel %vm28_vm0, %v1154_v37, -inf  ;;  %v120_v42 = vsel %vm28_vm0, %v1157_v38, -inf  ;;  %v121_v43 = vsel %vm28_vm0, %v1160_v39, -inf  ;;  %v122_v23 = vsel %vm28_vm0, %v1163_v40, -inf }
  0x4e   :  { %v123_v24 = vmax.f32 %v119_v41, %v120_v42  ;;  %v124_v44 = vmax.f32 %v121_v43, %v122_v23  ;;  %vm466_vm8 = vcmp.lt.s32.totalorder %v464_v30, %v465_v32 }
  0x4f   :  { %v467_v25 = vsel %vm466_vm8, %v464_v30, %v465_v32 }
  0x50   :  { %v125_v45 = vmax.f32 %v123_v24, %v124_v44  ;;  %v468_v46 = vrot.slane %v467_v25, 1 }
  0x52   :  { %v126_v26 = vrot.slane %v125_v45, 4  ;;  %vm469_vm9 = vcmp.lt.s32.totalorder %v467_v25, %v468_v46 }
  0x53   :  { %v470_v47 = vsel %vm469_vm9, %v467_v25, %v468_v46 }
  0x54   :  { %v127_v48 = vmax.f32 %v125_v45, %v126_v26  ;;  %vm471_vm10 = vcmp.eq.s32.totalorder %v1102_v50, %v470_v47  ;;  %vm472_vm11 = vcmp.eq.s32.totalorder %v1105_v55, %v470_v47  ;;  %vm473_vm12 = vcmp.eq.s32.totalorder %v1108_v56, %v470_v47 }
  0x55   :  { %vm474_vm13 = vcmp.eq.s32.totalorder %v1111_v57, %v470_v47  ;;  %v1178_v49 = vsel %vm471_vm10, -inf, %v1083_v33  ;;  %v1181_v51 = vsel %vm472_vm11, -inf, %v1086_v34  ;;  %v1184_v52 = vsel %vm473_vm12, -inf, %v1089_v35 }
  0x56   :  { %v128_v53 = vrot.slane %v127_v48, 2  ;;  %v1187_v54 = vsel %vm474_vm13, -inf, %v1092_v36  ;;  %v480_v59 = vsel %vm28_vm0, %v1178_v49, -inf  ;;  %v481_v60 = vsel %vm28_vm0, %v1181_v51, -inf }
  0x57   :  { %v482_v33 = vsel %vm28_vm0, %v1184_v52, -inf  ;;  %v483_v34 = vsel %vm28_vm0, %v1187_v54, -inf  ;;  %v484_v61 = vmax.f32 %v480_v59, %v481_v60 }
  0x58   :  { %v129_v62 = vmax.f32 %v127_v48, %v128_v53  ;;  %v485_v35 = vmax.f32 %v482_v33, %v483_v34 }
  0x5a   :  { %v130_v63 = vrot.slane %v129_v62, 1  ;;  %v486_v0 = vmax.f32 %v484_v61, %v485_v35 }
  0x5c   :  { %v131_v1 = vmax.f32 %v129_v62, %v130_v63  ;;  %v487_v36 = vrot.slane %v486_v0, 4 }
  0x5e   :  { %vm132_vm14 = vcmp.eq.f32.partialorder %v1154_v37, %v131_v1  ;;  %vm133_vm15 = vcmp.eq.f32.partialorder %v1157_v38, %v131_v1  ;;  %vm134_vm1 = vcmp.eq.f32.partialorder %v1160_v39, %v131_v1  ;;  %vm135_vm2 = vcmp.eq.f32.partialorder %v1163_v40, %v131_v1 }
  0x5f   :  { %v136_v2 = vsel %vm132_vm14, %v1102_v50, 32  ;;  %v137_v3 = vsel %vm133_vm15, %v1105_v55, 32  ;;  %v138_v4 = vsel %vm134_vm1, %v1108_v56, 32  ;;  %v139_v5 = vsel %vm135_vm2, %v1111_v57, 32 }
  0x60   :  { %v140_v6 = vsel %vm28_vm0, %v136_v2, 2147483647  ;;  %v141_v8 = vsel %vm28_vm0, %v137_v3, 2147483647  ;;  %v142_v9 = vsel %vm28_vm0, %v138_v4, 2147483647  ;;  %v1209_v10 = vadd.f32 %v131_v1, %v1113_v58 }
  0x61   :  { %v143_v11 = vsel %vm28_vm0, %v139_v5, 2147483647  ;;  %vm144_vm3 = vcmp.lt.s32.totalorder %v140_v6, %v141_v8  ;;  %v488_v12 = vmax.f32 %v486_v0, %v487_v36 }
  0x62   :  { %v145_v13 = vsel %vm144_vm3, %v140_v6, %v141_v8  ;;  %vm146_vm4 = vcmp.lt.s32.totalorder %v142_v9, %v143_v11 }
  0x63   :  { %v147_v14 = vsel %vm146_vm4, %v142_v9, %v143_v11  ;;  %v489_v15 = vrot.slane %v488_v12, 2 }
  0x64   :  { %vm148_vm5 = vcmp.lt.s32.totalorder %v145_v13, %v147_v14 }
  0x65   :  { %v149_v16 = vsel %vm148_vm5, %v145_v13, %v147_v14  ;;  %v490_v17 = vmax.f32 %v488_v12, %v489_v15 }
  0x66   :  { %v150_v18 = vrot.slane %v149_v16, 4 }
  0x67   :  { %v491_v19 = vrot.slane %v490_v17, 1 }
  0x68   :  { %vm151_vm6 = vcmp.lt.s32.totalorder %v149_v16, %v150_v18 }
  0x69   :  { %v152_v20 = vsel %vm151_vm6, %v149_v16, %v150_v18  ;;  %v1212_v21 = vmax.f32 %v490_v17, %v491_v19 }
  0x6a   :  { %v153_v22 = vrot.slane %v152_v20, 2 }
  0x6b   :  { %vm493_vm7 = vcmp.eq.f32.partialorder %v1178_v49, %v1212_v21  ;;  %vm494_vm8 = vcmp.eq.f32.partialorder %v1181_v51, %v1212_v21  ;;  %vm495_vm9 = vcmp.eq.f32.partialorder %v1184_v52, %v1212_v21  ;;  %vm496_vm10 = vcmp.eq.f32.partialorder %v1187_v54, %v1212_v21 }
  0x6c   :  { %vm154_vm11 = vcmp.lt.s32.totalorder %v152_v20, %v153_v22  ;;  %v497_v58 = vsel %vm493_vm7, %v1102_v50, 32  ;;  %v498_v27 = vsel %vm494_vm8, %v1105_v55, 32  ;;  %v499_v28 = vsel %vm495_vm9, %v1108_v56, 32 }
  0x6d   :  { %v155_v29 = vsel %vm154_vm11, %v152_v20, %v153_v22  ;;  %v500_v30 = vsel %vm496_vm10, %v1111_v57, 32  ;;  %v501_v31 = vsel %vm28_vm0, %v497_v58, 2147483647  ;;  %v502_v32 = vsel %vm28_vm0, %v498_v27, 2147483647 }
  0x6e   :  { %v156_v41 = vrot.slane %v155_v29, 1  ;;  %v503_v42 = vsel %vm28_vm0, %v499_v28, 2147483647  ;;  %v504_v43 = vsel %vm28_vm0, %v500_v30, 2147483647  ;;  %vm505_vm12 = vcmp.lt.s32.totalorder %v501_v31, %v502_v32 }
  0x6f   :  { %v506_v23 = vsel %vm505_vm12, %v501_v31, %v502_v32  ;;  %vm507_vm13 = vcmp.lt.s32.totalorder %v503_v42, %v504_v43 }
  0x70   :  { %vm157_vm14 = vcmp.lt.s32.totalorder %v155_v29, %v156_v41  ;;  %v508_v24 = vsel %vm507_vm13, %v503_v42, %v504_v43 }
  0x71   :  { %v158_v44 = vsel %vm157_vm14, %v155_v29, %v156_v41  ;;  %vm509_vm15 = vcmp.lt.s32.totalorder %v506_v23, %v508_v24 }
  0x72   :  { %vm159_vm1 = vcmp.eq.s32.totalorder %v1102_v50, %v158_v44  ;;  %vm160_vm2 = vcmp.eq.s32.totalorder %v1105_v55, %v158_v44  ;;  %vm161_vm3 = vcmp.eq.s32.totalorder %v1108_v56, %v158_v44  ;;  %vm162_vm4 = vcmp.eq.s32.totalorder %v1111_v57, %v158_v44 }
  0x73   :  { %v1235_v25 = vsel %vm159_vm1, -inf, %v1154_v37  ;;  %v1238_v45 = vsel %vm160_vm2, -inf, %v1157_v38  ;;  %v1241_v46 = vsel %vm161_vm3, -inf, %v1160_v39  ;;  %v1244_v26 = vsel %vm162_vm4, -inf, %v1163_v40 }
  0x74   :  { %v168_v47 = vsel %vm28_vm0, %v1235_v25, -inf  ;;  %v169_v48 = vsel %vm28_vm0, %v1238_v45, -inf  ;;  %v170_v53 = vsel %vm28_vm0, %v1241_v46, -inf  ;;  %v171_v37 = vsel %vm28_vm0, %v1244_v26, -inf }
  0x75   :  { %v172_v38 = vmax.f32 %v168_v47, %v169_v48  ;;  %v173_v59 = vmax.f32 %v170_v53, %v171_v37  ;;  %v510_v60 = vsel %vm509_vm15, %v506_v23, %v508_v24 }
  0x76   :  { %v511_v39 = vrot.slane %v510_v60, 4 }
  0x77   :  { %v174_v33 = vmax.f32 %v172_v38, %v173_v59 }
  0x78   :  { %vm512_vm5 = vcmp.lt.s32.totalorder %v510_v60, %v511_v39 }
  0x79   :  { %v175_v40 = vrot.slane %v174_v33, 4  ;;  %v513_v34 = vsel %vm512_vm5, %v510_v60, %v511_v39 }
  0x7a   :  { %v514_v61 = vrot.slane %v513_v34, 2 }
  0x7b   :  { %v176_v62 = vmax.f32 %v174_v33, %v175_v40 }
  0x7c   :  { %vm515_vm6 = vcmp.lt.s32.totalorder %v513_v34, %v514_v61 }
  0x7d   :  { %v177_v35 = vrot.slane %v176_v62, 2  ;;  %v516_v63 = vsel %vm515_vm6, %v513_v34, %v514_v61 }
  0x7e   :  { %v517_v0 = vrot.slane %v516_v63, 1 }
  0x7f   :  { %v178_v1 = vmax.f32 %v176_v62, %v177_v35 }
  0x80   :  { %vm518_vm7 = vcmp.lt.s32.totalorder %v516_v63, %v517_v0 }
  0x81   :  { %v179_v36 = vrot.slane %v178_v1, 1  ;;  %v519_v2 = vsel %vm518_vm7, %v516_v63, %v517_v0 }
  0x82   :  { %vm520_vm8 = vcmp.eq.s32.totalorder %v1102_v50, %v519_v2  ;;  %vm521_vm9 = vcmp.eq.s32.totalorder %v1105_v55, %v519_v2  ;;  %vm522_vm10 = vcmp.eq.s32.totalorder %v1108_v56, %v519_v2  ;;  %vm523_vm11 = vcmp.eq.s32.totalorder %v1111_v57, %v519_v2 }
  0x83   :  { %v180_v3 = vmax.f32 %v178_v1, %v179_v36  ;;  %v1259_v4 = vsel %vm520_vm8, -inf, %v1178_v49  ;;  %v1262_v5 = vsel %vm521_vm9, -inf, %v1181_v51  ;;  %v1265_v6 = vsel %vm522_vm10, -inf, %v1184_v52 }
  0x84   :  { %v1268_v8 = vsel %vm523_vm11, -inf, %v1187_v54  ;;  %v529_v9 = vsel %vm28_vm0, %v1259_v4, -inf  ;;  %v530_v11 = vsel %vm28_vm0, %v1262_v5, -inf  ;;  %v531_v12 = vsel %vm28_vm0, %v1265_v6, -inf }
  0x85   :  { %vm181_vm12 = vcmp.eq.f32.partialorder %v1235_v25, %v180_v3  ;;  %vm182_vm13 = vcmp.eq.f32.partialorder %v1238_v45, %v180_v3  ;;  %vm183_vm14 = vcmp.eq.f32.partialorder %v1241_v46, %v180_v3  ;;  %vm184_vm15 = vcmp.eq.f32.partialorder %v1244_v26, %v180_v3 }
  0x86   :  { %v185_v49 = vsel %vm181_vm12, %v1102_v50, 32  ;;  %v186_v51 = vsel %vm182_vm13, %v1105_v55, 32  ;;  %v187_v52 = vsel %vm183_vm14, %v1108_v56, 32  ;;  %v188_v54 = vsel %vm184_vm15, %v1111_v57, 32 }
  0x87   :  { %v189_v13 = vsel %vm28_vm0, %v185_v49, 2147483647  ;;  %v190_v14 = vsel %vm28_vm0, %v186_v51, 2147483647  ;;  %v191_v15 = vsel %vm28_vm0, %v187_v52, 2147483647  ;;  %v1288_v16 = vadd.f32 %v180_v3, %v1209_v10 }
  0x88   :  { %v192_v17 = vsel %vm28_vm0, %v188_v54, 2147483647  ;;  %vm193_vm1 = vcmp.lt.s32.totalorder %v189_v13, %v190_v14  ;;  %v532_v18 = vsel %vm28_vm0, %v1268_v8, -inf  ;;  %v533_v19 = vmax.f32 %v529_v9, %v530_v11 }
  0x89   :  { %v194_v20 = vsel %vm193_vm1, %v189_v13, %v190_v14  ;;  %vm195_vm2 = vcmp.lt.s32.totalorder %v191_v15, %v192_v17  ;;  %v534_v22 = vmax.f32 %v531_v12, %v532_v18 }
  0x8a   :  { %v196_v58 = vsel %vm195_vm2, %v191_v15, %v192_v17 }
  0x8b   :  { %vm197_vm3 = vcmp.lt.s32.totalorder %v194_v20, %v196_v58  ;;  %v535_v27 = vmax.f32 %v533_v19, %v534_v22 }
  0x8c   :  { %v198_v28 = vsel %vm197_vm3, %v194_v20, %v196_v58 }
  0x8d   :  { %v199_v29 = vrot.slane %v198_v28, 4  ;;  %v536_v30 = vrot.slane %v535_v27, 4 }
  0x8f   :  { %vm200_vm4 = vcmp.lt.s32.totalorder %v198_v28, %v199_v29  ;;  %v537_v31 = vmax.f32 %v535_v27, %v536_v30 }
  0x90   :  { %v201_v10 = vsel %vm200_vm4, %v198_v28, %v199_v29 }
  0x91   :  { %v202_v32 = vrot.slane %v201_v10, 2  ;;  %v538_v41 = vrot.slane %v537_v31, 2 }
  0x93   :  { %vm203_vm5 = vcmp.lt.s32.totalorder %v201_v10, %v202_v32  ;;  %v539_v42 = vmax.f32 %v537_v31, %v538_v41 }
  0x94   :  { %v204_v43 = vsel %vm203_vm5, %v201_v10, %v202_v32 }
  0x95   :  { %v205_v23 = vrot.slane %v204_v43, 1  ;;  %v540_v24 = vrot.slane %v539_v42, 1 }
  0x97   :  { %vm206_vm6 = vcmp.lt.s32.totalorder %v204_v43, %v205_v23  ;;  %v1293_v47 = vmax.f32 %v539_v42, %v540_v24 }
  0x98   :  { %v207_v44 = vsel %vm206_vm6, %v204_v43, %v205_v23 }
  0x99   :  { %vm208_vm7 = vcmp.eq.s32.totalorder %v1102_v50, %v207_v44  ;;  %vm209_vm8 = vcmp.eq.s32.totalorder %v1105_v55, %v207_v44  ;;  %vm210_vm9 = vcmp.eq.s32.totalorder %v1108_v56, %v207_v44  ;;  %vm211_vm10 = vcmp.eq.s32.totalorder %v1111_v57, %v207_v44 }
  0x9a   :  { %v1300_v48 = vsel %vm208_vm7, -inf, %v1235_v25  ;;  %v1303_v53 = vsel %vm209_vm8, -inf, %v1238_v45  ;;  %v1306_v37 = vsel %vm210_vm9, -inf, %v1241_v46  ;;  %v1309_v38 = vsel %vm211_vm10, -inf, %v1244_v26 }
  0x9b   :  { %v217_v59 = vsel %vm28_vm0, %v1300_v48, -inf  ;;  %v218_v60 = vsel %vm28_vm0, %v1303_v53, -inf  ;;  %v219_v39 = vsel %vm28_vm0, %v1306_v37, -inf  ;;  %v220_v25 = vsel %vm28_vm0, %v1309_v38, -inf }
  0x9c   :  { %v221_v45 = vmax.f32 %v217_v59, %v218_v60  ;;  %v222_v33 = vmax.f32 %v219_v39, %v220_v25  ;;  %vm542_vm11 = vcmp.eq.f32.partialorder %v1259_v4, %v1293_v47  ;;  %vm543_vm12 = vcmp.eq.f32.partialorder %v1262_v5, %v1293_v47 }
  0x9d   :  { %vm544_vm13 = vcmp.eq.f32.partialorder %v1265_v6, %v1293_v47  ;;  %vm545_vm14 = vcmp.eq.f32.partialorder %v1268_v8, %v1293_v47  ;;  %v546_v46 = vsel %vm542_vm11, %v1102_v50, 32  ;;  %v547_v26 = vsel %vm543_vm12, %v1105_v55, 32 }
  0x9e   :  { %v223_v40 = vmax.f32 %v221_v45, %v222_v33  ;;  %v548_v34 = vsel %vm544_vm13, %v1108_v56, 32  ;;  %v549_v61 = vsel %vm545_vm14, %v1111_v57, 32  ;;  %v550_v62 = vsel %vm28_vm0, %v546_v46, 2147483647 }
  0x9f   :  { %v551_v35 = vsel %vm28_vm0, %v547_v26, 2147483647  ;;  %v552_v63 = vsel %vm28_vm0, %v548_v34, 2147483647  ;;  %v553_v0 = vsel %vm28_vm0, %v549_v61, 2147483647 }
  0xa0   :  { %v224_v1 = vrot.slane %v223_v40, 4  ;;  %vm554_vm15 = vcmp.lt.s32.totalorder %v550_v62, %v551_v35  ;;  %vm556_vm1 = vcmp.lt.s32.totalorder %v552_v63, %v553_v0 }
  0xa1   :  { %v555_v36 = vsel %vm554_vm15, %v550_v62, %v551_v35  ;;  %v557_v2 = vsel %vm556_vm1, %v552_v63, %v553_v0 }
  0xa2   :  { %v225_v3 = vmax.f32 %v223_v40, %v224_v1  ;;  %vm558_vm2 = vcmp.lt.s32.totalorder %v555_v36, %v557_v2 }
  0xa3   :  { %v559_v9 = vsel %vm558_vm2, %v555_v36, %v557_v2 }
  0xa4   :  { %v226_v11 = vrot.slane %v225_v3, 2  ;;  %v560_v12 = vrot.slane %v559_v9, 4 }
  0xa6   :  { %v227_v49 = vmax.f32 %v225_v3, %v226_v11  ;;  %vm561_vm3 = vcmp.lt.s32.totalorder %v559_v9, %v560_v12  ;;  %v528_v11 = vadd.f32 %v1212_v21, %v1131_v7 }
  0xa7   :  { %v562_v51 = vsel %vm561_vm3, %v559_v9, %v560_v12 }
  0xa8   :  { %v228_v52 = vrot.slane %v227_v49, 1  ;;  %v563_v54 = vrot.slane %v562_v51, 2 }
  0xaa   :  { %v229_v13 = vmax.f32 %v227_v49, %v228_v52  ;;  %vm564_vm4 = vcmp.lt.s32.totalorder %v562_v51, %v563_v54  ;;  %v577_v49 = vadd.f32 %v1293_v47, %v528_v11 }
  0xab   :  { %v565_v14 = vsel %vm564_vm4, %v562_v51, %v563_v54 }
  0xac   :  { %vm230_vm5 = vcmp.eq.f32.partialorder %v1300_v48, %v229_v13  ;;  %vm231_vm6 = vcmp.eq.f32.partialorder %v1303_v53, %v229_v13  ;;  %vm232_vm7 = vcmp.eq.f32.partialorder %v1306_v37, %v229_v13  ;;  %vm233_vm8 = vcmp.eq.f32.partialorder %v1309_v38, %v229_v13 }
  0xad   :  { %v234_v15 = vsel %vm230_vm5, %v1102_v50, 32  ;;  %v235_v17 = vsel %vm231_vm6, %v1105_v55, 32  ;;  %v236_v18 = vsel %vm232_vm7, %v1108_v56, 32  ;;  %v237_v19 = vsel %vm233_vm8, %v1111_v57, 32 }
  0xae   :  { %v238_v20 = vsel %vm28_vm0, %v234_v15, 2147483647  ;;  %v239_v22 = vsel %vm28_vm0, %v235_v17, 2147483647  ;;  %v240_v58 = vsel %vm28_vm0, %v236_v18, 2147483647  ;;  %v1347_v27 = vadd.f32 %v229_v13, %v1288_v16 }
  0xaf   :  { %v241_v28 = vsel %vm28_vm0, %v237_v19, 2147483647  ;;  %vm242_vm9 = vcmp.lt.s32.totalorder %v238_v20, %v239_v22  ;;  %v566_v29 = vrot.slane %v565_v14, 1 }
  0xb0   :  { %v243_v30 = vsel %vm242_vm9, %v238_v20, %v239_v22  ;;  %vm244_vm10 = vcmp.lt.s32.totalorder %v240_v58, %v241_v28 }
  0xb1   :  { %v245_v31 = vsel %vm244_vm10, %v240_v58, %v241_v28  ;;  %vm567_vm11 = vcmp.lt.s32.totalorder %v565_v14, %v566_v29 }
  0xb2   :  { %vm246_vm12 = vcmp.lt.s32.totalorder %v243_v30, %v245_v31  ;;  %v568_v10 = vsel %vm567_vm11, %v565_v14, %v566_v29 }
  0xb3   :  { %v247_v32 = vsel %vm246_vm12, %v243_v30, %v245_v31  ;;  %vm569_vm13 = vcmp.eq.s32.totalorder %v1102_v50, %v568_v10  ;;  %vm570_vm14 = vcmp.eq.s32.totalorder %v1105_v55, %v568_v10  ;;  %vm571_vm15 = vcmp.eq.s32.totalorder %v1108_v56, %v568_v10 }
  0xb4   :  { %v248_v41 = vrot.slane %v247_v32, 4  ;;  %vm572_vm1 = vcmp.eq.s32.totalorder %v1111_v57, %v568_v10  ;;  %v1355_v16 = vsel %vm569_vm13, -inf, %v1259_v4  ;;  %v1358_v42 = vsel %vm570_vm14, -inf, %v1262_v5 }
  0xb5   :  { %v1361_v43 = vsel %vm571_vm15, -inf, %v1265_v6  ;;  %v1364_v23 = vsel %vm572_vm1, -inf, %v1268_v8  ;;  %v578_v24 = vsel %vm28_vm0, %v1355_v16, -inf  ;;  %v579_v44 = vsel %vm28_vm0, %v1358_v42, -inf }
  0xb6   :  { %vm249_vm2 = vcmp.lt.s32.totalorder %v247_v32, %v248_v41  ;;  %v580_v4 = vsel %vm28_vm0, %v1361_v43, -inf  ;;  %v581_v5 = vsel %vm28_vm0, %v1364_v23, -inf  ;;  %v582_v59 = vmax.f32 %v578_v24, %v579_v44 }
  0xb7   :  { %v250_v60 = vsel %vm249_vm2, %v247_v32, %v248_v41  ;;  %v583_v6 = vmax.f32 %v580_v4, %v581_v5 }
  0xb8   :  { %v251_v39 = vrot.slane %v250_v60, 2 }
  0xb9   :  { %v584_v25 = vmax.f32 %v582_v59, %v583_v6 }
  0xba   :  { %vm252_vm3 = vcmp.lt.s32.totalorder %v250_v60, %v251_v39 }
  0xbb   :  { %v253_v8 = vsel %vm252_vm3, %v250_v60, %v251_v39  ;;  %v585_v45 = vrot.slane %v584_v25, 4 }
  0xbc   :  { %v254_v33 = vrot.slane %v253_v8, 1 }
  0xbd   :  { %v586_v46 = vmax.f32 %v584_v25, %v585_v45 }
  0xbe   :  { %vm255_vm4 = vcmp.lt.s32.totalorder %v253_v8, %v254_v33 }
  0xbf   :  { %v256_v26 = vsel %vm255_vm4, %v253_v8, %v254_v33  ;;  %v587_v40 = vrot.slane %v586_v46, 2  ;;  %v1433_v33 = vld [vmem:[%s1751_s0] sm:$0xff] }
  0xc0   :  { %vm257_vm5 = vcmp.eq.s32.totalorder %v1102_v50, %v256_v26  ;;  %vm258_vm6 = vcmp.eq.s32.totalorder %v1105_v55, %v256_v26  ;;  %vm259_vm7 = vcmp.eq.s32.totalorder %v1108_v56, %v256_v26  ;;  %vm260_vm8 = vcmp.eq.s32.totalorder %v1111_v57, %v256_v26 }
  0xc1   :  { %v1379_v34 = vsel %vm257_vm5, -inf, %v1300_v48  ;;  %v1382_v61 = vsel %vm258_vm6, -inf, %v1303_v53  ;;  %v1385_v62 = vsel %vm259_vm7, -inf, %v1306_v37  ;;  %v1388_v35 = vsel %vm260_vm8, -inf, %v1309_v38 }
  0xc2   :  { %v266_v63 = vsel %vm28_vm0, %v1379_v34, -inf  ;;  %v267_v0 = vsel %vm28_vm0, %v1382_v61, -inf  ;;  %v268_v1 = vsel %vm28_vm0, %v1385_v62, -inf  ;;  %v269_v48 = vsel %vm28_vm0, %v1388_v35, -inf }
  0xc3   :  { %v270_v53 = vmax.f32 %v266_v63, %v267_v0  ;;  %v271_v36 = vmax.f32 %v268_v1, %v269_v48  ;;  %v588_v2 = vmax.f32 %v586_v46, %v587_v40  ;;  %v26_v26 = vmul.f32 %v1433_v33, %v1433_v33 }
  0xc5   :  { %v272_v37 = vmax.f32 %v270_v53, %v271_v36  ;;  %v589_v3 = vrot.slane %v588_v2, 1  ;;  %v29_v11 = vsel %vm28_vm0, %v26_v26, 0.0 }
  0xc7   :  { %v273_v9 = vrot.slane %v272_v37, 4  ;;  %v590_v38 = vmax.f32 %v588_v2, %v589_v3 }
  0xc9   :  { %v274_v12 = vmax.f32 %v272_v37, %v273_v9  ;;  %vm591_vm9 = vcmp.eq.f32.partialorder %v1355_v16, %v590_v38  ;;  %vm592_vm10 = vcmp.eq.f32.partialorder %v1358_v42, %v590_v38  ;;  %vm593_vm11 = vcmp.eq.f32.partialorder %v1361_v43, %v590_v38 }
  0xca   :  { %vm594_vm12 = vcmp.eq.f32.partialorder %v1364_v23, %v590_v38  ;;  %v595_v51 = vsel %vm591_vm9, %v1102_v50, 32  ;;  %v596_v52 = vsel %vm592_vm10, %v1105_v55, 32  ;;  %v597_v13 = vsel %vm593_vm11, %v1108_v56, 32 }
  0xcb   :  { %v275_v54 = vrot.slane %v274_v12, 2  ;;  %v598_v7 = vsel %vm594_vm12, %v1111_v57, 32  ;;  %v599_v21 = vsel %vm28_vm0, %v595_v51, 2147483647  ;;  %v600_v14 = vsel %vm28_vm0, %v596_v52, 2147483647 }
  0xcc   :  { %v601_v15 = vsel %vm28_vm0, %v597_v13, 2147483647  ;;  %v602_v17 = vsel %vm28_vm0, %v598_v7, 2147483647  ;;  %v1413_v47 = vadd.f32 %v590_v38, %v577_v49  ;;  %vm603_vm13 = vcmp.lt.s32.totalorder %v599_v21, %v600_v14 }
  0xcd   :  { %v276_v18 = vmax.f32 %v274_v12, %v275_v54  ;;  %vm605_vm14 = vcmp.lt.s32.totalorder %v601_v15, %v602_v17  ;;  %v604_v19 = vsel %vm603_vm13, %v599_v21, %v600_v14 }
  0xce   :  { %v606_v20 = vsel %vm605_vm14, %v601_v15, %v602_v17 }
  0xcf   :  { %v277_v22 = vrot.slane %v276_v18, 1  ;;  %vm607_vm15 = vcmp.lt.s32.totalorder %v604_v19, %v606_v20 }
  0xd0   :  { %v608_v58 = vsel %vm607_vm15, %v604_v19, %v606_v20 }
  0xd1   :  { %v278_v28 = vmax.f32 %v276_v18, %v277_v22  ;;  %v609_v29 = vrot.slane %v608_v58, 4 }
  0xd3   :  { %vm279_vm1 = vcmp.eq.f32.partialorder %v1379_v34, %v278_v28  ;;  %vm280_vm2 = vcmp.eq.f32.partialorder %v1382_v61, %v278_v28  ;;  %vm281_vm3 = vcmp.eq.f32.partialorder %v1385_v62, %v278_v28  ;;  %vm282_vm4 = vcmp.eq.f32.partialorder %v1388_v35, %v278_v28 }
  0xd4   :  { %v283_v30 = vsel %vm279_vm1, %v1102_v50, 32  ;;  %v284_v31 = vsel %vm280_vm2, %v1105_v55, 32  ;;  %v285_v10 = vsel %vm281_vm3, %v1108_v56, 32  ;;  %v286_v32 = vsel %vm282_vm4, %v1111_v57, 32 }
  0xd5   :  { %v287_v41 = vsel %vm28_vm0, %v283_v30, 2147483647  ;;  %v288_v24 = vsel %vm28_vm0, %v284_v31, 2147483647  ;;  %v289_v44 = vsel %vm28_vm0, %v285_v10, 2147483647  ;;  %v1427_v4 = vadd.f32 %v278_v28, %v1347_v27 }
  0xd6   :  { %v290_v5 = vsel %vm28_vm0, %v286_v32, 2147483647  ;;  %vm291_vm5 = vcmp.lt.s32.totalorder %v287_v41, %v288_v24  ;;  %vm610_vm6 = vcmp.lt.s32.totalorder %v608_v58, %v609_v29 }
  0xd7   :  { %v292_v59 = vsel %vm291_vm5, %v287_v41, %v288_v24  ;;  %vm293_vm7 = vcmp.lt.s32.totalorder %v289_v44, %v290_v5  ;;  %v611_v60 = vsel %vm610_vm6, %v608_v58, %v609_v29 }
  0xd8   :  { %v294_v6 = vsel %vm293_vm7, %v289_v44, %v290_v5  ;;  %v612_v39 = vrot.slane %v611_v60, 2 }
  0xd9   :  { %vm295_vm8 = vcmp.lt.s32.totalorder %v292_v59, %v294_v6 }
  0xda   :  { %v296_v25 = vsel %vm295_vm8, %v292_v59, %v294_v6  ;;  %vm613_vm9 = vcmp.lt.s32.totalorder %v611_v60, %v612_v39 }
  0xdb   :  { %v297_v8 = vrot.slane %v296_v25, 4  ;;  %v614_v45 = vsel %vm613_vm9, %v611_v60, %v612_v39 }
  0xdc   :  { %v615_v27 = vrot.slane %v614_v45, 1 }
  0xdd   :  { %vm298_vm10 = vcmp.lt.s32.totalorder %v296_v25, %v297_v8 }
  0xde   :  { %v299_v46 = vsel %vm298_vm10, %v296_v25, %v297_v8  ;;  %vm616_vm11 = vcmp.lt.s32.totalorder %v614_v45, %v615_v27 }
  0xdf   :  { %v300_v40 = vrot.slane %v299_v46, 2  ;;  %v617_v63 = vsel %vm616_vm11, %v614_v45, %v615_v27 }
  0xe0   :  { %vm618_vm12 = vcmp.eq.s32.totalorder %v1102_v50, %v617_v63  ;;  %vm619_vm13 = vcmp.eq.s32.totalorder %v1105_v55, %v617_v63  ;;  %vm620_vm14 = vcmp.eq.s32.totalorder %v1108_v56, %v617_v63  ;;  %vm621_vm15 = vcmp.eq.s32.totalorder %v1111_v57, %v617_v63 }
  0xe1   :  { %vm301_vm1 = vcmp.lt.s32.totalorder %v299_v46, %v300_v40  ;;  %v1442_v0 = vsel %vm618_vm12, -inf, %v1355_v16  ;;  %v1445_v1 = vsel %vm619_vm13, -inf, %v1358_v42  ;;  %v1448_v48 = vsel %vm620_vm14, -inf, %v1361_v43  ;;  %v1460_v16 = vld [vmem:[%s1751_s0 + $0x8] sm:$0xff] }
  0xe2   :  { %v302_v53 = vsel %vm301_vm1, %v299_v46, %v300_v40  ;;  %v1451_v36 = vsel %vm621_vm15, -inf, %v1364_v23  ;;  %v627_v2 = vsel %vm28_vm0, %v1442_v0, -inf  ;;  %v628_v37 = vsel %vm28_vm0, %v1445_v1, -inf }
  0xe3   :  { %v303_v42 = vrot.slane %v302_v53, 1  ;;  %v629_v43 = vsel %vm28_vm0, %v1448_v48, -inf  ;;  %v630_v3 = vsel %vm28_vm0, %v1451_v36, -inf  ;;  %v631_v23 = vmax.f32 %v627_v2, %v628_v37 }
  0xe4   :  { %v632_v9 = vmax.f32 %v629_v43, %v630_v3  ;;  %v27_v38 = vmul.f32 %v1460_v16, %v1460_v16 }
  0xe5   :  { %vm304_vm2 = vcmp.lt.s32.totalorder %v302_v53, %v303_v42 }
  0xe6   :  { %v305_v12 = vsel %vm304_vm2, %v302_v53, %v303_v42  ;;  %v633_v49 = vmax.f32 %v631_v23, %v632_v9 }
  0xe7   :  { %vm306_vm3 = vcmp.eq.s32.totalorder %v1102_v50, %v305_v12  ;;  %vm307_vm4 = vcmp.eq.s32.totalorder %v1105_v55, %v305_v12  ;;  %vm308_vm5 = vcmp.eq.s32.totalorder %v1108_v56, %v305_v12  ;;  %vm309_vm6 = vcmp.eq.s32.totalorder %v1111_v57, %v305_v12 }
  0xe8   :  { %v1474_v51 = vsel %vm306_vm3, -inf, %v1379_v34  ;;  %v1477_v52 = vsel %vm307_vm4, -inf, %v1382_v61  ;;  %v1480_v54 = vsel %vm308_vm5, -inf, %v1385_v62  ;;  %v1483_v13 = vsel %vm309_vm6, -inf, %v1388_v35 }
  0xe9   :  { %v315_v7 = vsel %vm28_vm0, %v1474_v51, -inf  ;;  %v316_v21 = vsel %vm28_vm0, %v1477_v52, -inf  ;;  %v317_v14 = vsel %vm28_vm0, %v1480_v54, -inf  ;;  %v318_v34 = vsel %vm28_vm0, %v1483_v13, -inf }
  0xea   :  { %v30_v61 = vsel %vm28_vm0, %v27_v38, 0.0  ;;  %v319_v15 = vmax.f32 %v315_v7, %v316_v21  ;;  %v320_v62 = vmax.f32 %v317_v14, %v318_v34  ;;  %v634_v17 = vrot.slane %v633_v49, 4 }
  0xeb   :  { %v31_v19 = vadd.f32 %v30_v61, %v29_v11 }
  0xec   :  { %v321_v18 = vmax.f32 %v319_v15, %v320_v62  ;;  %v635_v35 = vmax.f32 %v633_v49, %v634_v17  ;;  %v804_v17 = vld [vmem:[%s1752_s3] sm:$0xff] }
  0xed   :  { %v32_v29 = vrot.slane %v31_v19, 4 }
  0xee   :  { %v322_v20 = vrot.slane %v321_v18, 4  ;;  %v636_v22 = vrot.slane %v635_v35, 2 }
  0xef   :  { %v33_v41 = vadd.f32 %v32_v29, %v31_v19 }
  0xf0   :  { %v323_v58 = vmax.f32 %v321_v18, %v322_v20  ;;  %v637_v28 = vmax.f32 %v635_v35, %v636_v22  ;;  %v806_v18 = vld [vmem:[%s1752_s3 + $0x10] sm:$0xff]  ;;  %v1018_v22 = vmov 0  }
  0xf1   :  { %v34_v38 = vrot.slane %v33_v41, 2  ;;  %1011 = vset.pattern.permute.xlu1 %v1018_v22  ;;  %1010 = vset.pattern.permute.xlu0 %v1018_v22 }
  0xf2   :  { %v324_v30 = vrot.slane %v323_v58, 2  ;;  %v638_v31 = vrot.slane %v637_v28, 1 }
  0xf4   :  { %v325_v10 = vmax.f32 %v323_v58, %v324_v30  ;;  %v639_v32 = vmax.f32 %v637_v28, %v638_v31  ;;  %v810_v58 = vld [vmem:[%s1753_s4 + $0x10] sm:$0xff]  ;;  %v808_v28 = vld [vmem:[%s1753_s4] sm:$0xff] }
  0xf5   :  { %824 = vperm.xlu1 %1011, %v810_v58   ;;  %814 = vperm.xlu0 %1010, %v808_v28  }
  0xf6   :  { %v326_v24 = vrot.slane %v325_v10, 1  ;;  %vm640_vm7 = vcmp.eq.f32.partialorder %v1442_v0, %v639_v32  ;;  %vm641_vm8 = vcmp.eq.f32.partialorder %v1445_v1, %v639_v32  ;;  %vm642_vm9 = vcmp.eq.f32.partialorder %v1448_v48, %v639_v32 }
  0xf7   :  { %vm643_vm10 = vcmp.eq.f32.partialorder %v1451_v36, %v639_v32  ;;  %v644_v44 = vsel %vm640_vm7, %v1102_v50, 32  ;;  %v645_v5 = vsel %vm641_vm8, %v1105_v55, 32  ;;  %v646_v59 = vsel %vm642_vm9, %v1108_v56, 32 }
  0xf8   :  { %v327_v60 = vmax.f32 %v325_v10, %v326_v24  ;;  %v647_v6 = vsel %vm643_vm10, %v1111_v57, 32  ;;  %v648_v39 = vsel %vm28_vm0, %v644_v44, 2147483647  ;;  %v649_v25 = vsel %vm28_vm0, %v645_v5, 2147483647  ;;  %v811_v10 = vld [vmem:[%s1753_s4 + $0x18] sm:$0xff] }
  0xf9   :  { %v650_v8 = vsel %vm28_vm0, %v646_v59, 2147483647  ;;  %v651_v45 = vsel %vm28_vm0, %v647_v6, 2147483647  ;;  %vm652_vm11 = vcmp.lt.s32.totalorder %v648_v39, %v649_v25  ;;  %v1507_v27 = vadd.f32 %v639_v32, %v1413_v47  ;;  %v809_v32 = vld [vmem:[%s1753_s4 + $0x8] sm:$0xff]  ;;  %829 = vperm.xlu1 %1011, %v811_v10  }
  0xfa   :  { %vm328_vm12 = vcmp.eq.f32.partialorder %v1474_v51, %v327_v60  ;;  %vm329_vm13 = vcmp.eq.f32.partialorder %v1477_v52, %v327_v60  ;;  %vm330_vm14 = vcmp.eq.f32.partialorder %v1480_v54, %v327_v60  ;;  %vm331_vm15 = vcmp.eq.f32.partialorder %v1483_v13, %v327_v60  ;;  %819 = vperm.xlu0 %1010, %v809_v32  }
  0xfb   :  { %v332_v46 = vsel %vm328_vm12, %v1102_v50, 32  ;;  %v333_v26 = vsel %vm329_vm13, %v1105_v55, 32  ;;  %v334_v40 = vsel %vm330_vm14, %v1108_v56, 32  ;;  %v335_v63 = vsel %vm331_vm15, %v1111_v57, 32 }
  0xfc   :  { %v336_v53 = vsel %vm28_vm0, %v332_v46, 2147483647  ;;  %v337_v47 = vsel %vm28_vm0, %v333_v26, 2147483647  ;;  %v338_v2 = vsel %vm28_vm0, %v334_v40, 2147483647  ;;  %v1521_v37 = vadd.f32 %v327_v60, %v1427_v4 }
  0xfd   :  { %v339_v42 = vsel %vm28_vm0, %v335_v63, 2147483647  ;;  %vm340_vm1 = vcmp.lt.s32.totalorder %v336_v53, %v337_v47  ;;  %v653_v43 = vsel %vm652_vm11, %v648_v39, %v649_v25  ;;  %vm654_vm2 = vcmp.lt.s32.totalorder %v650_v8, %v651_v45 }
  0xfe   :  { %v341_v3 = vsel %vm340_vm1, %v336_v53, %v337_v47  ;;  %vm342_vm3 = vcmp.lt.s32.totalorder %v338_v2, %v339_v42  ;;  %v655_v23 = vsel %vm654_vm2, %v650_v8, %v651_v45  ;;  %v35_v4 = vadd.f32 %v34_v38, %v33_v41 }
  0xff   :  { %v343_v9 = vsel %vm342_vm3, %v338_v2, %v339_v42  ;;  %vm656_vm4 = vcmp.lt.s32.totalorder %v653_v43, %v655_v23  ;;  %vm832_vm9 = vcmask 261120   ;;  %v1019_v53 = vmov 1  }
 0x100   :  { %vm344_vm5 = vcmp.lt.s32.totalorder %v341_v3, %v343_v9  ;;  %v657_v11 = vsel %vm656_vm4, %v653_v43, %v655_v23  ;;  %v36_v15 = vrot.slane %v35_v4, 1  ;;  %990 = vmatprep.mubr.msk.f32.mxu0 %vm832_vm9, %v804_v17  ;;  %993 = vmatprep.mubr.msk.f32.mxu1 %vm832_vm9, %v806_v18 }
 0x101   :  { %v345_v12 = vsel %vm344_vm5, %v341_v3, %v343_v9  ;;  %v658_v49 = vrot.slane %v657_v11, 4  ;;  %1013 = vset.pattern.permute.xlu1 %v1019_v53  ;;  %1012 = vset.pattern.permute.xlu0 %v1019_v53 }
 0x102   :  { %v346_v7 = vrot.slane %v345_v12, 4  ;;  %v37_v29 = vadd.f32 %v36_v15, %v35_v4  ;;  %936 = vperm.xlu1 %1013, %v809_v32   ;;  %932 = vperm.xlu0 %1012, %v808_v28  }
 0x103   :  { %vm659_vm6 = vcmp.lt.s32.totalorder %v657_v11, %v658_v49 }
 0x104   :  { %vm347_vm7 = vcmp.lt.s32.totalorder %v345_v12, %v346_v7  ;;  %v660_v21 = vsel %vm659_vm6, %v657_v11, %v658_v49  ;;  %v38_v40 = vmax.f32 %v37_v29, 1e-24 }
 0x105   :  { %v348_v14 = vsel %vm347_vm7, %v345_v12, %v346_v7  ;;  %v661_v34 = vrot.slane %v660_v21, 2 }
 0x106   :  { %v349_v61 = vrot.slane %v348_v14, 2  ;;  %1016 = vrsqrt.f32 %v38_v40  ;;  %940 = vperm.xlu1 %1013, %v810_v58   ;;  %944 = vperm.xlu0 %1012, %v811_v10  }
 0x107   :  { %vm662_vm8 = vcmp.lt.s32.totalorder %v660_v21, %v661_v34 }
 0x108   :  { %vm350_vm10 = vcmp.lt.s32.totalorder %v348_v14, %v349_v61  ;;  %v663_v62 = vsel %vm662_vm8, %v660_v21, %v661_v34 }
 0x109   :  { %v351_v35 = vsel %vm350_vm10, %v348_v14, %v349_v61  ;;  %v664_v19 = vrot.slane %v663_v62, 1 }
 0x10a   :  { %v352_v20 = vrot.slane %v351_v35, 1 }
 0x10b   :  { %vm665_vm11 = vcmp.lt.s32.totalorder %v663_v62, %v664_v19 }
 0x10c   :  { %vm353_vm12 = vcmp.lt.s32.totalorder %v351_v35, %v352_v20  ;;  %v666_v30 = vsel %vm665_vm11, %v663_v62, %v664_v19 }
 0x10d   :  { %v354_v31 = vsel %vm353_vm12, %v351_v35, %v352_v20  ;;  %vm667_vm13 = vcmp.eq.s32.totalorder %v1102_v50, %v666_v30  ;;  %vm668_vm14 = vcmp.eq.s32.totalorder %v1105_v55, %v666_v30  ;;  %vm669_vm15 = vcmp.eq.s32.totalorder %v1108_v56, %v666_v30 }
 0x10e   :  { %vm355_vm1 = vcmp.eq.s32.totalorder %v1102_v50, %v354_v31  ;;  %vm356_vm2 = vcmp.eq.s32.totalorder %v1105_v55, %v354_v31  ;;  %vm357_vm3 = vcmp.eq.s32.totalorder %v1108_v56, %v354_v31  ;;  %vm358_vm4 = vcmp.eq.s32.totalorder %v1111_v57, %v354_v31 }
 0x10f   :  { %v1553_v41 = vsel %vm355_vm1, -inf, %v1474_v51  ;;  %v1556_v24 = vsel %vm356_vm2, -inf, %v1477_v52  ;;  %v1559_v44 = vsel %vm357_vm3, -inf, %v1480_v54  ;;  %v1562_v5 = vsel %vm358_vm4, -inf, %v1483_v13 }
 0x110   :  { %v364_v59 = vsel %vm28_vm0, %v1553_v41, -inf  ;;  %v365_v60 = vsel %vm28_vm0, %v1556_v24, -inf  ;;  %v366_v6 = vsel %vm28_vm0, %v1559_v44, -inf  ;;  %v367_v51 = vsel %vm28_vm0, %v1562_v5, -inf  ;;  %v1017_v7 = vpop.eup %1016 }
 0x111   :  { %v368_v52 = vmax.f32 %v364_v59, %v365_v60  ;;  %v369_v54 = vmax.f32 %v366_v6, %v367_v51  ;;  %vm670_vm5 = vcmp.eq.s32.totalorder %v1111_v57, %v666_v30  ;;  %v1576_v13 = vsel %vm667_vm13, -inf, %v1442_v0 }
 0x112   :  { %v1581_v39 = vsel %vm668_vm14, -inf, %v1445_v1  ;;  %v1586_v25 = vsel %vm669_vm15, -inf, %v1448_v48  ;;  %v1589_v8 = vsel %vm670_vm5, -inf, %v1451_v36  ;;  %v676_v45 = vsel %vm28_vm0, %v1576_v13, -inf }
 0x113   :  { %v370_v46 = vmax.f32 %v368_v52, %v369_v54  ;;  %v677_v0 = vsel %vm28_vm0, %v1581_v39, -inf  ;;  %v678_v26 = vsel %vm28_vm0, %v1586_v25, -inf  ;;  %v679_v1 = vsel %vm28_vm0, %v1589_v8, -inf }
 0x114   :  { %v680_v63 = vmax.f32 %v676_v45, %v677_v0  ;;  %v681_v48 = vmax.f32 %v678_v26, %v679_v1  ;;  %v1618_v35 = vmul.f32 %v1017_v7, %v1433_v33  ;;  %v1621_v19 = vmul.f32 %v1017_v7, %v1460_v16 }
 0x115   :  { %v371_v36 = vrot.slane %v370_v46, 4  ;;  %v790_v30 = vmul.f32 0.16666667, %v1521_v37 }
 0x116   :  { %v682_v47 = vmax.f32 %v680_v63, %v681_v48  ;;  %v798_v6 = vsub.f32 0.0, %v1618_v35  ;;  %v799_v51 = vsub.f32 0.0, %v1621_v19  ;;  %vm792_vm5 = vcmp.ge.f32.partialorder %v1618_v35, 0.0 }
 0x117   :  { %v372_v2 = vmax.f32 %v370_v46, %v371_v36 }
 0x118   :  { %v683_v42 = vrot.slane %v682_v47, 4 }
 0x119   :  { %v373_v43 = vrot.slane %v372_v2, 2 }
 0x11a   :  { %v684_v3 = vmax.f32 %v682_v47, %v683_v42 }
 0x11b   :  { %v374_v23 = vmax.f32 %v372_v2, %v373_v43 }
 0x11c   :  { %v685_v9 = vrot.slane %v684_v3, 2 }
 0x11d   :  { %v375_v38 = vrot.slane %v374_v23, 1 }
 0x11e   :  { %v686_v11 = vmax.f32 %v684_v3, %v685_v9 }
 0x11f   :  { %v1599_v12 = vmax.f32 %v374_v23, %v375_v38 }
 0x120   :  { %v687_v49 = vrot.slane %v686_v11, 1 }
 0x121   :  { %vm377_vm6 = vcmp.eq.f32.partialorder %v1553_v41, %v1599_v12  ;;  %vm378_vm7 = vcmp.eq.f32.partialorder %v1556_v24, %v1599_v12  ;;  %vm379_vm8 = vcmp.eq.f32.partialorder %v1559_v44, %v1599_v12  ;;  %vm380_vm10 = vcmp.eq.f32.partialorder %v1562_v5, %v1599_v12 }
 0x122   :  { %v381_v4 = vsel %vm377_vm6, %v1102_v50, 32  ;;  %v382_v21 = vsel %vm378_vm7, %v1105_v55, 32  ;;  %v383_v14 = vsel %vm379_vm8, %v1108_v56, 32  ;;  %v384_v34 = vsel %vm380_vm10, %v1111_v57, 32 }
 0x123   :  { %v385_v61 = vsel %vm28_vm0, %v381_v4, 2147483647  ;;  %v386_v15 = vsel %vm28_vm0, %v382_v21, 2147483647  ;;  %v387_v62 = vsel %vm28_vm0, %v383_v14, 2147483647  ;;  %v688_v18 = vmax.f32 %v686_v11, %v687_v49 }
 0x124   :  { %v388_v17 = vsel %vm28_vm0, %v384_v34, 2147483647  ;;  %vm389_vm11 = vcmp.lt.s32.totalorder %v385_v61, %v386_v15  ;;  %vm793_vm6 = vcmp.ge.f32.partialorder %v1621_v19, 0.0 }
 0x125   :  { %v390_v20 = vsel %vm389_vm11, %v385_v61, %v386_v15  ;;  %vm391_vm12 = vcmp.lt.s32.totalorder %v387_v62, %v388_v17  ;;  %vm689_vm13 = vcmp.eq.f32.partialorder %v1576_v13, %v688_v18  ;;  %vm690_vm14 = vcmp.eq.f32.partialorder %v1581_v39, %v688_v18 }
 0x126   :  { %v392_v22 = vsel %vm391_vm12, %v387_v62, %v388_v17  ;;  %vm691_vm15 = vcmp.eq.f32.partialorder %v1586_v25, %v688_v18  ;;  %vm692_vm2 = vcmp.eq.f32.partialorder %v1589_v8, %v688_v18  ;;  %v693_v58 = vsel %vm689_vm13, %v1102_v50, 32 }
 0x127   :  { %vm393_vm1 = vcmp.lt.s32.totalorder %v390_v20, %v392_v22  ;;  %v694_v33 = vsel %vm690_vm14, %v1105_v55, 32  ;;  %v695_v28 = vsel %vm691_vm15, %v1108_v56, 32  ;;  %v696_v16 = vsel %vm692_vm2, %v1111_v57, 32 }
 0x128   :  { %v697_v29 = vsel %vm28_vm0, %v693_v58, 2147483647  ;;  %v394_v31 = vsel %vm393_vm1, %v390_v20, %v392_v22  ;;  %v698_v10 = vsel %vm28_vm0, %v694_v33, 2147483647  ;;  %v699_v32 = vsel %vm28_vm0, %v695_v28, 2147483647 }
 0x129   :  { %v1636_v59 = vadd.f32 %v688_v18, %v1507_v27  ;;  %v700_v60 = vsel %vm28_vm0, %v696_v16, 2147483647  ;;  %vm701_vm3 = vcmp.lt.s32.totalorder %v697_v29, %v698_v10  ;;  %v395_v45 = vrot.slane %v394_v31, 4 }
 0x12a   :  { %v702_v52 = vsel %vm701_vm3, %v697_v29, %v698_v10  ;;  %vm703_vm4 = vcmp.lt.s32.totalorder %v699_v32, %v700_v60 }
 0x12b   :  { %v791_v54 = vmul.f32 -0.16666667, %v1636_v59  ;;  %v704_v46 = vsel %vm703_vm4, %v699_v32, %v700_v60  ;;  %vm396_vm8 = vcmp.lt.s32.totalorder %v394_v31, %v395_v45 }
 0x12c   :  { %vm705_vm7 = vcmp.lt.s32.totalorder %v702_v52, %v704_v46  ;;  %v397_v36 = vsel %vm396_vm8, %v394_v31, %v395_v45 }
 0x12d   :  { %v800_v27 = vsel %vm792_vm5, %v791_v54, %v790_v30  ;;  %v801_v0 = vsel %vm793_vm6, %v791_v54, %v790_v30  ;;  %v706_v26 = vsel %vm705_vm7, %v702_v52, %v704_v46  ;;  %v398_v2 = vrot.slane %v397_v36, 2 }
 0x12e   :  { %v802_v1 = vmul.f32 %v800_v27, %v798_v6  ;;  %v803_v40 = vmul.f32 %v801_v0, %v799_v51  ;;  %v707_v63 = vrot.slane %v706_v26, 4 }
 0x12f   :  { %vm399_vm12 = vcmp.lt.s32.totalorder %v397_v36, %v398_v2 }
 0x130   :  { %v1648_v48 = vpack.c.bf16 %v803_v40, %v802_v1  ;;  %vm708_vm10 = vcmp.lt.s32.totalorder %v706_v26, %v707_v63  ;;  %v400_v3 = vsel %vm399_vm12, %v397_v36, %v398_v2 }
 0x131   :  { %v709_v53 = vsel %vm708_vm10, %v706_v26, %v707_v63  ;;  %v401_v49 = vrot.slane %v400_v3, 1 }
 0x132   :  { %v710_v47 = vrot.slane %v709_v53, 2 }
 0x133   :  { %vm402_vm3 = vcmp.lt.s32.totalorder %v400_v3, %v401_v49 }
 0x134   :  { %vm711_vm11 = vcmp.lt.s32.totalorder %v709_v53, %v710_v47  ;;  %v403_v15 = vsel %vm402_vm3, %v400_v3, %v401_v49 }
 0x135   :  { %v712_v42 = vsel %vm711_vm11, %v709_v53, %v710_v47  ;;  %vm404_vm4 = vcmp.eq.s32.totalorder %v1102_v50, %v403_v15  ;;  %vm405_vm7 = vcmp.eq.s32.totalorder %v1105_v55, %v403_v15  ;;  %vm406_vm8 = vcmp.eq.s32.totalorder %v1108_v56, %v403_v15 }
 0x136   :  { %v713_v43 = vrot.slane %v712_v42, 1  ;;  %vm407_vm10 = vcmp.eq.s32.totalorder %v1111_v57, %v403_v15  ;;  %v408_v18 = vsel %vm404_vm4, -inf, %v1553_v41  ;;  %v409_v20 = vsel %vm405_vm7, -inf, %v1556_v24 }
 0x137   :  { %v410_v22 = vsel %vm406_vm8, -inf, %v1559_v44  ;;  %v411_v58 = vsel %vm407_vm10, -inf, %v1562_v5  ;;  %v413_v16 = vsel %vm28_vm0, %v408_v18, -inf  ;;  %v414_v29 = vsel %vm28_vm0, %v409_v20, -inf }
 0x138   :  { %vm714_vm13 = vcmp.lt.s32.totalorder %v712_v42, %v713_v43  ;;  %v415_v30 = vsel %vm28_vm0, %v410_v22, -inf  ;;  %v416_v31 = vsel %vm28_vm0, %v411_v58, -inf  ;;  %v417_v6 = vmax.f32 %v413_v16, %v414_v29 }
 0x139   :  { %v715_v23 = vsel %vm714_vm13, %v712_v42, %v713_v43  ;;  %v418_v51 = vmax.f32 %v415_v30, %v416_v31 }
 0x13a   :  { %vm716_vm14 = vcmp.eq.s32.totalorder %v1102_v50, %v715_v23  ;;  %vm717_vm15 = vcmp.eq.s32.totalorder %v1105_v55, %v715_v23  ;;  %vm718_vm1 = vcmp.eq.s32.totalorder %v1108_v56, %v715_v23  ;;  %vm719_vm2 = vcmp.eq.s32.totalorder %v1111_v57, %v715_v23 }
 0x13b   :  { %v1655_v9 = vsel %vm716_vm14, -inf, %v1576_v13  ;;  %v1658_v38 = vsel %vm717_vm15, -inf, %v1581_v39  ;;  %v1661_v11 = vsel %vm718_vm1, -inf, %v1586_v25  ;;  %v1664_v7 = vsel %vm719_vm2, -inf, %v1589_v8 }
 0x13c   :  { %v725_v4 = vsel %vm28_vm0, %v1655_v9, -inf  ;;  %v726_v21 = vsel %vm28_vm0, %v1658_v38, -inf  ;;  %v727_v13 = vsel %vm28_vm0, %v1661_v11, -inf  ;;  %v728_v39 = vsel %vm28_vm0, %v1664_v7, -inf }
 0x13d   :  { %v729_v14 = vmax.f32 %v725_v4, %v726_v21  ;;  %v730_v34 = vmax.f32 %v727_v13, %v728_v39  ;;  %v419_v46 = vmax.f32 %v417_v6, %v418_v51 }
 0x13f   :  { %v731_v25 = vmax.f32 %v729_v14, %v730_v34  ;;  %v420_v26 = vrot.slane %v419_v46, 4 }
 0x141   :  { %v732_v61 = vrot.slane %v731_v25, 4  ;;  %v421_v63 = vmax.f32 %v419_v46, %v420_v26 }
 0x143   :  { %v733_v8 = vmax.f32 %v731_v25, %v732_v61  ;;  %v422_v47 = vrot.slane %v421_v63, 2 }
 0x145   :  { %v734_v62 = vrot.slane %v733_v8, 2  ;;  %v423_v21 = vmax.f32 %v421_v63, %v422_v47 }
 0x147   :  { %v735_v17 = vmax.f32 %v733_v8, %v734_v62  ;;  %v424_v39 = vrot.slane %v423_v21, 1 }
 0x149   :  { %v736_v33 = vrot.slane %v735_v17, 1 }
 0x14b   :  { %v737_v28 = vmax.f32 %v735_v17, %v736_v33 }
 0x14d   :  { %vm738_vm11 = vcmp.eq.f32.partialorder %v1655_v9, %v737_v28  ;;  %vm739_vm12 = vcmp.eq.f32.partialorder %v1658_v38, %v737_v28  ;;  %vm740_vm13 = vcmp.eq.f32.partialorder %v1661_v11, %v737_v28  ;;  %vm741_vm14 = vcmp.eq.f32.partialorder %v1664_v7, %v737_v28 }
 0x14e   :  { %v742_v41 = vsel %vm738_vm11, %v1102_v50, 32  ;;  %v743_v24 = vsel %vm739_vm12, %v1105_v55, 32  ;;  %v744_v44 = vsel %vm740_vm13, %v1108_v56, 32  ;;  %v745_v5 = vsel %vm741_vm14, %v1111_v57, 32 }
 0x14f   :  { %v746_v10 = vsel %vm28_vm0, %v742_v41, 2147483647  ;;  %v747_v32 = vsel %vm28_vm0, %v743_v24, 2147483647  ;;  %v748_v60 = vsel %vm28_vm0, %v744_v44, 2147483647  ;;  %v773_v61 = vadd.f32 %v737_v28, %v1636_v59 }
 0x150   :  { %v749_v52 = vsel %vm28_vm0, %v745_v5, 2147483647  ;;  %vm750_vm15 = vcmp.lt.s32.totalorder %v746_v10, %v747_v32  ;;  %v805_v59 = vld [vmem:[%s1752_s3 + $0x8] sm:$0xff] }
 0x151   :  { %v751_v54 = vsel %vm750_vm15, %v746_v10, %v747_v32  ;;  %vm752_vm1 = vcmp.lt.s32.totalorder %v748_v60, %v749_v52 }
 0x152   :  { %v753_v45 = vsel %vm752_vm1, %v748_v60, %v749_v52 }
 0x153   :  { %vm754_vm2 = vcmp.lt.s32.totalorder %v751_v54, %v753_v45 }
 0x154   :  { %v755_v27 = vsel %vm754_vm2, %v751_v54, %v753_v45 }
 0x155   :  { %v756_v0 = vrot.slane %v755_v27, 4 }
 0x157   :  { %vm757_vm3 = vcmp.lt.s32.totalorder %v755_v27, %v756_v0 }
 0x158   :  { %v758_v1 = vsel %vm757_vm3, %v755_v27, %v756_v0 }
 0x159   :  { %v759_v40 = vrot.slane %v758_v1, 2 }
 0x15b   :  { %vm760_vm4 = vcmp.lt.s32.totalorder %v758_v1, %v759_v40 }
 0x15c   :  { %v761_v53 = vsel %vm760_vm4, %v758_v1, %v759_v40 }
 0x15d   :  { %v762_v36 = vrot.slane %v761_v53, 1 }
 0x15f   :  { %vm763_vm7 = vcmp.lt.s32.totalorder %v761_v53, %v762_v36 }
 0x160   :  { %v764_v2 = vsel %vm763_vm7, %v761_v53, %v762_v36 }
 0x161   :  { %vm765_vm8 = vcmp.eq.s32.totalorder %v1102_v50, %v764_v2  ;;  %vm766_vm10 = vcmp.eq.s32.totalorder %v1105_v55, %v764_v2  ;;  %vm767_vm11 = vcmp.eq.s32.totalorder %v1108_v56, %v764_v2  ;;  %vm768_vm12 = vcmp.eq.s32.totalorder %v1111_v57, %v764_v2 }
 0x162   :  { %v769_v42 = vsel %vm765_vm8, -inf, %v1655_v9  ;;  %v770_v43 = vsel %vm766_vm10, -inf, %v1658_v38  ;;  %v771_v3 = vsel %vm767_vm11, -inf, %v1661_v11  ;;  %v772_v23 = vsel %vm768_vm12, -inf, %v1664_v7 }
 0x163   :  { %v774_v49 = vsel %vm28_vm0, %v769_v42, -inf  ;;  %v775_v4 = vsel %vm28_vm0, %v770_v43, -inf  ;;  %v776_v50 = vsel %vm28_vm0, %v771_v3, -inf  ;;  %v777_v55 = vsel %vm28_vm0, %v772_v23, -inf }
 0x164   :  { %v778_v56 = vmax.f32 %v774_v49, %v775_v4  ;;  %v779_v13 = vmax.f32 %v776_v50, %v777_v55  ;;  %v412_v38 = vadd.f32 %v1599_v12, %v1521_v37  ;;  %v425_v11 = vmax.f32 %v423_v21, %v424_v39 }
 0x166   :  { %v780_v57 = vmax.f32 %v778_v56, %v779_v13  ;;  %v426_v25 = vadd.f32 %v425_v11, %v412_v38 }
 0x168   :  { %v781_v9 = vrot.slane %v780_v57, 4  ;;  %v788_v17 = vmul.f32 0.125, %v426_v25 }
 0x16a   :  { %v782_v14 = vmax.f32 %v780_v57, %v781_v9 }
 0x16c   :  { %v783_v7 = vrot.slane %v782_v14, 2 }
 0x16e   :  { %v784_v34 = vmax.f32 %v782_v14, %v783_v7 }
 0x170   :  { %v785_v15 = vrot.slane %v784_v34, 1 }
 0x172   :  { %v786_v8 = vmax.f32 %v784_v34, %v785_v15 }
 0x174   :  { %v787_v62 = vadd.f32 %v786_v8, %v773_v61  ;;  %v825_v33 = vpop.permute.xlu1 %824 }
 0x176   :  { %v789_v18 = vmul.f32 -0.125, %v787_v62 }
 0x178   :  { %v794_v20 = vsel %vm792_vm5, %v788_v17, %v789_v18  ;;  %v795_v22 = vsel %vm793_vm6, %v788_v17, %v789_v18  ;;  %v830_v16 = vpop.permute.xlu1 %829 }
 0x179   :  { %v796_v58 = vmul.f32 %v794_v20, %v1618_v35  ;;  %v797_v37 = vmul.f32 %v795_v22, %v1621_v19  ;;  %v807_v35 = vld [vmem:[%s1752_s3 + $0x18] sm:$0xff]  ;;  %v815_v19 = vpop.permute.xlu0 %814 }
 0x17b   :  { %v996_v12 = vpack.c.bf16 %v797_v37, %v796_v58 }
 0x17d   :  { %997 = vmatprep.subr.bf16.mxu0 %v996_v12  ;;  %1004 = vmatprep.subr.bf16.mxu1 %v996_v12  ;;  %v820_v28 = vpop.permute.xlu0 %819 }
 0x17e   :  { %999 = vmatpush3.bf16.msra.mxu0 %v996_v12  ;;  %1006 = vmatpush3.bf16.msra.mxu1 %v996_v12 }
 0x17f   :  { %1001 = vmatprep.subr.bf16.mxu0 %v1648_v48  ;;  %1005 = vmatprep.subr.bf16.mxu1 %v1648_v48 }
 0x181   :  { %v933_v29 = vpop.permute.xlu0 %932  ;;  %v937_v30 = vpop.permute.xlu1 %936 }
 0x182   :  { %1003 = vmatpush3.bf16.msra.mxu0 %v1648_v48  ;;  %1007 = vmatpush3.bf16.msra.mxu1 %v1648_v48  ;;  %v973_v48 = vld [vmem:[%s1754_s2] ss:$0 sm:$0xff] }
 0x183   :  { %v954_v5 = vmul.f32 %v973_v48, %v937_v30  ;;  %v953_v52 = vmul.f32 %v973_v48, %v933_v29 }
 0x185   :  { %991 = vmatmul.mubr.msk.f32.vlgmr.msra.gmra.mrb[0].mxu0 %vm832_vm9, %v805_v59  ;;  %994 = vmatmul.mubr.msk.f32.vlgmr.msra.gmra.mrb[0].mxu1 %vm832_vm9, %v807_v35  ;;  %v945_v31 = vpop.permute.xlu0 %944  ;;  %v941_v41 = vpop.permute.xlu1 %940 }
 0x186   :  { %v956_v10 = vmul.f32 %v973_v48, %v945_v31  ;;  %v955_v54 = vmul.f32 %v973_v48, %v941_v41 }
 0x258   :  { %v992_v24 = vpop.f32.mrb[0].mxu0  ;;  %v995_v44 = vpop.f32.mrb[0].mxu1 }
 0x259   :  { %v917_v32 = vadd.f32 %v992_v24, %v820_v28  ;;  %v927_v60 = vadd.f32 %v995_v44, %v830_v16  ;;  %v911_v6 = vpop.f32.mrb[1].mxu0  ;;  %v921_v51 = vpop.f32.mrb[1].mxu1 }
 0x25a   :  { %v912_v45 = vadd.f32 %v911_v6, %v815_v19  ;;  %v922_v46 = vadd.f32 %v921_v51, %v825_v33 }
 0x25b   :  { %v958_v27 = vadd.f32 %v954_v5, %v917_v32  ;;  %v960_v0 = vadd.f32 %v956_v10, %v927_v60 }
 0x25c   :  { %v957_v26 = vadd.f32 %v953_v52, %v912_v45  ;;  %v959_v1 = vadd.f32 %v955_v54, %v922_v46 }
 0x25d   :  { %962 = vst.msk [vmem:[%s1755_s5 + $0x8] sm:$0xff] %vm28_vm0, %v958_v27  ;;  %964 = vst.msk [vmem:[%s1755_s5 + $0x18] sm:$0xff] %vm28_vm0, %v960_v0 }
 0x25e   :  { %961 = vst.msk [vmem:[%s1755_s5] sm:$0xff] %vm28_vm0, %v957_v26  ;;  %963 = vst.msk [vmem:[%s1755_s5 + $0x10] sm:$0xff] %vm28_vm0, %v959_v1 }

</bundles_post_ra>
